<compile_context>
chip_gen: v5e
topology: v5e:2x2
jax: 0.10.0
libtpu: 0.0.40
codegen_flags: <defaults>
</compile_context>

<pallas_src>
import math
import functools

import numpy as np
import jax
import jax.numpy as jnp
from jax.experimental import pallas as pl
from jax.experimental.pallas import tpu as pltpu

LANE = 128
M_PAD = 8          # padded number of matched (query, electron) pairs
C_PAD = 8          # padded number of occupancy classes (sublane axis)
WIN = 7            # bce_window_size
NUM_OUTPUTS = 12

# slots in the fused kernel's SMEM result row
(O_CLASS_LOSS, O_CLASS_ACC, O_ELECTRON_ACC, O_NO_ELECTRON_ACC,
 O_BCE_LOSS, O_BINARY_ACC, O_DICE_LOSS, O_NLL_LOSS, O_MSE_LOSS,
 O_OCC_LOSS, O_OCC_ACC, O_TOTAL_LOSS) = range(NUM_OUTPUTS)

# buffer A (narrow, 128 lanes) row indices
A_CLS_LOGIT, A_CLS_LABEL, A_CLS_MASK = 0, 1, 2
A_PT_R, A_PT_C, A_CTR_R, A_CTR_C, A_L00, A_L10, A_L11, A_DM = 3, 4, 5, 6, 7, 8, 9, 10
A_ROWS = 16

# buffer B (wide, B*HW lanes) row offsets
B_DICE_T = 0
B_DICE_Z = B_DICE_T + M_PAD
B_DICE_M = B_DICE_Z + M_PAD
B_OCC_X = B_DICE_M + M_PAD
B_OCC_OH = B_OCC_X + C_PAD
B_BCE_P = B_OCC_OH + C_PAD
B_BCE_T = B_BCE_P + 1
B_BCE_M = B_BCE_T + 1
B_ROWS = 48


def _bce_with_logits(x, y):
    # numerically stable BCE-with-logits: max(x,0) - x*y + log1p(exp(-|x|)).
    # log1p is expanded by hand (t - t^2/2 branch) so we do not rely on a
    # Mosaic log1p lowering while keeping PyTorch-level precision for large |x|.
    t = jnp.exp(-jnp.abs(x))
    log1p_t = jnp.where(t < 1e-4, t * (1.0 - 0.5 * t), jnp.log(1.0 + t))
    return jnp.maximum(x, 0.0) - x * y + log1p_t


def _div0(num, den):
    # exact when den > 0; returns 0 instead of NaN in degenerate (empty) cases
    den_safe = jnp.where(den > 0, den, 1.0)
    return jnp.where(den > 0, num / den_safe, 0.0)


def _stack_rows(rows):
    """Pack (1, width) rows into an (n, width) block using broadcast + select
    only (avoids sublane-unaligned concatenation)."""
    n = len(rows)
    width = rows[0].shape[-1]
    rid = jax.lax.broadcasted_iota(jnp.int32, (n, width), 0)
    acc = jnp.zeros((n, width), jnp.float32)
    for i, row in enumerate(rows):
        acc = acc + jnp.where(rid == i, row, 0.0)
    return acc


def _at(col, i):
    """Extract element i of an (n, 1) reduction column as a rank-0 scalar via a
    masked full reduce (uses only iota/where/reduce, all known-good lowerings)."""
    rid = jax.lax.broadcasted_iota(jnp.int32, col.shape, 0)
    return jnp.sum(jnp.where(rid == i, col, 0.0))


def fused_loss_kernel(a_ref, b_ref, o_ref, *, loss_weights, no_electron_weight,
                      n_batch, hw, n_occ_classes):
    f32 = jnp.float32
    neg = f32(-1e30)
    wide = b_ref.shape[-1]

    # ------------------ class loss (queries on lanes) ----------------------
    x = a_ref[A_CLS_LOGIT:A_CLS_LOGIT + 1, :]
    y = a_ref[A_CLS_LABEL:A_CLS_LABEL + 1, :]
    m = a_ref[A_CLS_MASK:A_CLS_MASK + 1, :]
    w = jnp.where(y > 0.5, 1.0, f32(no_electron_weight)) * m
    correct = jnp.where((x > 0.0).astype(f32) == y, 1.0, 0.0) * m

    # ------------- Gaussian NLL + MSE (matched pairs on lanes) -------------
    x0 = a_ref[A_PT_R:A_PT_R + 1, :]
    x1 = a_ref[A_PT_C:A_PT_C + 1, :]
    c0 = a_ref[A_CTR_R:A_CTR_R + 1, :]
    c1 = a_ref[A_CTR_C:A_CTR_C + 1, :]
    la = a_ref[A_L00:A_L00 + 1, :]
    lb = a_ref[A_L10:A_L10 + 1, :]
    lc = a_ref[A_L11:A_L11 + 1, :]
    dm = a_ref[A_DM:A_DM + 1, :]
    d0 = x0 - c0
    d1 = x1 - c1
    la_s = jnp.where(dm > 0, la, 1.0)     # guard padded lanes (layout artifact only)
    lc_s = jnp.where(dm > 0, lc, 1.0)
    z0 = d0 / la_s
    z1 = (d1 - lb * z0) / lc_s
    nll = (0.5 * (z0 * z0 + z1 * z1) + jnp.log(la_s) + jnp.log(lc_s)
           + f32(math.log(2.0 * math.pi)))
    # TODO(synk): reference clamps only inf (loss[loss.isinf()] = 1e7); NaN from a
    # non-positive Cholesky diagonal of a matched pair stays unguarded, as there.
    nll = jnp.where(jnp.isinf(nll), 1e7, nll)

    ra = _stack_rows([
        w * _bce_with_logits(x, y),    # 0: class BCE numerator
        m,                             # 1: #queries
        correct,                       # 2: #correct
        y * m,                         # 3: #positive
        correct * y,                   # 4: #correct positive
        nll * dm,                      # 5: NLL numerator
        dm,                            # 6: #matched pairs
        (d0 * d0 + d1 * d1) * dm,      # 7: squared-error numerator
    ])
    col_a = jnp.sum(ra, axis=-1, keepdims=True)      # single cross-lane reduce

    # -------------- wide block: dice, occupancy, windowed BCE --------------
    t = b_ref[B_DICE_T:B_DICE_T + M_PAD, :]
    z = b_ref[B_DICE_Z:B_DICE_Z + M_PAD, :]
    pm = b_ref[B_DICE_M:B_DICE_M + M_PAD, :]
    ox = b_ref[B_OCC_X:B_OCC_X + C_PAD, :]
    oh = b_ref[B_OCC_OH:B_OCC_OH + C_PAD, :]
    bp = b_ref[B_BCE_P:B_BCE_P + 1, :]
    bt = b_ref[B_BCE_T:B_BCE_T + 1, :]
    bm = b_ref[B_BCE_M:B_BCE_M + 1, :]

    cls_idx = jax.lax.broadcasted_iota(jnp.int32, ox.shape, 0)
    cls_valid = cls_idx < n_occ_classes
    cvalid = cls_valid.astype(f32)
    cls_f = cls_idx.astype(f32)
    cw = jnp.where(cls_idx == 0, f32(no_electron_weight), 1.0) * cvalid

    # mask first, then exponentiate the masked values (padding underflows to 0,
    # never overflows) -- correctness-review fix.
    zm = jnp.where(pm > 0, z, neg)
    xm = jnp.where(cls_valid, ox, neg)
    both = jnp.concatenate([zm, xm], axis=-1)                  # (M_PAD, 2*wide)
    mx = jnp.max(both, axis=0, keepdims=True)                  # fused sublane max
    mx_d = mx[:, :wide]
    mx_o = mx[:, wide:]
    mx_d = jnp.where(mx_d > 0.5 * neg, mx_d, 0.0)              # pixels w/o specified entries
    e = jnp.exp(both - jnp.concatenate([mx_d, mx_o], axis=-1))
    s = jnp.sum(e, axis=0, keepdims=True)                      # fused sublane sum
    e_d = e[:, :wide]
    den_d = s[:, :wide]
    s_o = s[:, wide:]
    # sparse softmax over specified portion entries (EUP approx reciprocal)
    portion = e_d * pl.reciprocal(jnp.where(den_d > 0, den_d, 1.0), approx=True)
    lse = mx_o + jnp.log(s_o)                                  # occupancy log-sum-exp

    # one fused sublane reduction for every dice / occupancy per-pixel sum
    g = jnp.concatenate([
        2.0 * t * portion,        # -> dice numerator per pixel
        t + portion,              # -> dice denominator per pixel
        oh * (ox - lse),          # -> log prob of the target class
        oh * cw,                  # -> weight of the target class
        oh,                       # -> pixel has a target (valid)
        oh * cls_f,               # -> target class index
    ], axis=-1)                   # (M_PAD, 6*wide)
    gs = jnp.sum(g, axis=0, keepdims=True)
    dice_num = gs[:, 0 * wide:1 * wide]
    dice_den = gs[:, 1 * wide:2 * wide]
    logp_t = gs[:, 2 * wide:3 * wide]
    w_t = gs[:, 3 * wide:4 * wide]
    pix_valid = gs[:, 4 * wide:5 * wide]
    tgt_idx = gs[:, 5 * wide:6 * wide]

    # occupancy argmax with first-occurrence tie-break (torch.argmax semantics)
    cand = jnp.where(xm == mx_o, cls_f, f32(1e9))
    first_max = jnp.min(cand, axis=0, keepdims=True)
    occ_correct = jnp.where(first_max == tgt_idx, 1.0, 0.0) * pix_valid

    # TODO(synk): exact float equality like the reference; silently wrong if the
    # true segmap ever holds fractional portions instead of {0,1}.
    b_correct = jnp.where((bp > 0.0).astype(f32) == bt, 1.0, 0.0) * bm

    lane = jax.lax.broadcasted_iota(jnp.int32, (1, wide), 1)
    per_batch = []
    for b in range(n_batch):       # static lane masks: dice batch loop folded on lanes
        in_b = ((lane >= b * hw) & (lane < (b + 1) * hw)).astype(f32)
        per_batch.append(dice_num * in_b)
        per_batch.append(dice_den * in_b)

    rb = _stack_rows([
        _bce_with_logits(bp, bt) * bm,    # 0: window BCE numerator
        bm,                               # 1: #window elements
        b_correct,                        # 2: #correct window elements
        -logp_t * w_t,                    # 3: occupancy CE numerator
        w_t,                              # 4: occupancy CE denominator
        occ_correct,                      # 5: #correct occupancy pixels
        pix_valid,                        # 6: #occupancy pixels
    ] + per_batch)
    col_b = jnp.sum(rb, axis=-1, keepdims=True)      # single cross-lane reduce

    # ---------------- scalars, ratios, weighted total -----------------------
    class_num, n_q, n_corr, n_pos, corr_pos, nll_num, n_m, sq_num = (
        _at(col_a, i) for i in range(8))
    class_loss = _div0(class_num, n_q)
    class_acc = _div0(n_corr, n_q)
    electron_acc = _div0(corr_pos, n_pos)
    no_electron_acc = _div0(n_corr - corr_pos, n_q - n_pos)
    nll_loss = _div0(nll_num, n_m)
    mse_loss = _div0(sq_num, 2.0 * n_m)

    n_win = _at(col_b, 1)
    bce_loss = _div0(_at(col_b, 0), n_win)
    binary_acc = _div0(_at(col_b, 2), n_win)
    occupancy_loss = _div0(_at(col_b, 3), _at(col_b, 4))
    occupancy_acc = _div0(_at(col_b, 5), _at(col_b, 6))

    dice_sum = f32(0.0)
    for b in range(n_batch):
        num_b = _at(col_b, 7 + 2 * b)
        den_b = _at(col_b, 8 + 2 * b)
        dice_sum = dice_sum + (1.0 - (num_b + 1.0) / (den_b + 1.0))
    dice_loss = dice_sum / f32(n_batch)

    total_loss = (loss_weights[0] * class_loss + loss_weights[1] * bce_loss
                  + loss_weights[2] * dice_loss + loss_weights[3] * nll_loss
                  + loss_weights[4] * mse_loss + loss_weights[5] * occupancy_loss)

    o_ref[O_CLASS_LOSS] = class_loss
    o_ref[O_CLASS_ACC] = class_acc
    o_ref[O_ELECTRON_ACC] = electron_acc
    o_ref[O_NO_ELECTRON_ACC] = no_electron_acc
    o_ref[O_BCE_LOSS] = bce_loss
    o_ref[O_BINARY_ACC] = binary_acc
    o_ref[O_DICE_LOSS] = dice_loss
    o_ref[O_NLL_LOSS] = nll_loss
    o_ref[O_MSE_LOSS] = mse_loss
    o_ref[O_OCC_LOSS] = occupancy_loss
    o_ref[O_OCC_ACC] = occupancy_acc
    o_ref[O_TOTAL_LOSS] = total_loss


# ----------------------------------------------------------------------------
# driver: synthetic data + device-side glue + single fused kernel call
# ----------------------------------------------------------------------------
if __name__ == "__main__":
    key = jax.random.PRNGKey(0)
    keys = jax.random.split(key, 10)

    # ---- problem sizes -----------------------------------------------------
    B = 2
    H = W = 16
    HW = H * W
    WIDE = B * HW                       # lane width of the wide buffer
    n_queries = [5, 3]
    n_electrons = [3, 2]
    Nq = sum(n_queries)
    Ne = sum(n_electrons)
    batch_offsets = np.array([0, 5, 8])
    electron_offsets = np.array([0, 3, 5])
    C_occ = 4

    # ---- Criterion coefficients (module defaults) ---------------------------
    loss_coef_class = 1.0
    loss_coef_mask_bce = 1.0
    loss_coef_mask_dice = 1.0
    loss_coef_incidence_nll = 1.0
    loss_coef_incidence_mse = 1.0
    loss_coef_occupancy = 1.0
    no_electron_weight = 0.1

    # ---- predicted / target tensors -----------------------------------------
    is_electron_logit = jax.random.normal(keys[0], (Nq,), jnp.float32)
    positions = jax.random.uniform(keys[1], (Nq, 2), jnp.float32, 3.0, 13.0)
    diag = np.asarray(jax.random.uniform(keys[2], (Nq, 2), jnp.float32, 0.5, 1.5))
    offd = np.asarray(jax.random.normal(keys[3], (Nq,), jnp.float32)) * 0.1
    chol_np = np.zeros((Nq, 2, 2), np.float32)
    chol_np[:, 0, 0] = diag[:, 0]
    chol_np[:, 1, 1] = diag[:, 1]
    chol_np[:, 1, 0] = offd
    chol = jnp.asarray(chol_np)

    incidence_points = jax.random.uniform(keys[4], (Ne, 2), jnp.float32, 4.0, 12.0)
    local_com_xy = jax.random.uniform(keys[5], (Ne, 2), jnp.float32, 0.0, 1.0)
    local_inc_xy = local_com_xy + 0.05 * jax.random.normal(keys[6], (Ne, 2), jnp.float32)

    # TODO(synk): HungarianMatcher (LAP solver) has no Pallas equivalent; use a
    # fixed deterministic matching [pred_query_idx; target_electron_idx].
    matched_indices = [np.array([[2, 0, 4], [0, 1, 2]]), np.array([[1, 2], [0, 1]])]
    M_per_batch = [mi.shape[1] for mi in matched_indices]
    M_total = sum(M_per_batch)

    inc_np = np.asarray(incidence_points)
    pos_np = np.asarray(positions)

    # dense-equivalent "sparse" segmaps: values (0 where unspecified) + pred mask
    E_max = max(n_electrons)
    Q_max = max(n_queries)
    true_seg = np.zeros((B, H, W, E_max), np.float32)
    pred_smask = np.zeros((B, H, W, Q_max), np.float32)
    for b in range(B):
        for e in range(n_electrons[b]):
            r, c = np.floor(inc_np[electron_offsets[b] + e]).astype(int)
            true_seg[b, max(r - 2, 0):r + 3, max(c - 2, 0):c + 3, e] = 1.0
        for q in range(n_queries[b]):
            r, c = np.floor(pos_np[batch_offsets[b] + q]).astype(int)
            pred_smask[b, max(r - 2, 0):r + 3, max(c - 2, 0):c + 3, q] = 1.0
    bin_dense = np.asarray(jax.random.normal(keys[7], (B, H, W, Q_max), jnp.float32)) * pred_smask
    por_dense = np.asarray(jax.random.normal(keys[8], (B, H, W, Q_max), jnp.float32)) * pred_smask

    # occupancy: sparse logits (pixel indices + per-class logits) + count map
    occ_idx = np.array([(b, r, c) for b in range(B) for r in range(4, 9) for c in range(4, 9)],
                       dtype=np.int32)
    Npix = occ_idx.shape[0]
    occ_logits = jax.random.normal(keys[9], (Npix, C_occ), jnp.float32)
    count_map = np.zeros((B, H, W), np.int32)
    for b in range(B):
        for e in range(n_electrons[b]):
            r, c = np.floor(inc_np[electron_offsets[b] + e]).astype(int)
            count_map[b, r, c] = min(count_map[b, r, c] + 1, C_occ - 1)

    # ---- static matcher-derived index arrays (host side) --------------------
    q_local = np.concatenate([mi[0] for mi in matched_indices]).astype(np.int32)
    e_local = np.concatenate([mi[1] for mi in matched_indices]).astype(np.int32)
    b_of_match = np.concatenate(
        [np.full(mi.shape[1], b) for b, mi in enumerate(matched_indices)]).astype(np.int32)
    q_global = (q_local + batch_offsets[b_of_match]).astype(np.int32)
    e_global = (e_local + electron_offsets[b_of_match]).astype(np.int32)

    e_sel = np.zeros((B, M_PAD), np.int32)
    q_sel = np.zeros((B, M_PAD), np.int32)
    m_valid = np.zeros((B, M_PAD), np.float32)
    for b, matched in enumerate(matched_indices):
        mb = matched.shape[1]
        q_sel[b, :mb] = matched[0]
        e_sel[b, :mb] = matched[1]
        m_valid[b, :mb] = 1.0

    labels_np = np.zeros((Nq,), np.float32)
    labels_np[q_global] = 1.0
    cls_const = np.stack([labels_np, np.ones((Nq,), np.float32)], 0)   # labels; valid mask

    bce_mask_row = np.zeros((WIDE,), np.float32)
    bce_mask_row[:M_total * WIN * WIN] = 1.0

    half = WIN // 2
    off_r, off_c = np.meshgrid(np.arange(-half, half + 1, dtype=np.int32),
                               np.arange(-half, half + 1, dtype=np.int32), indexing="ij")

    assert Nq <= LANE and M_total <= min(M_PAD, LANE)
    assert max(M_per_batch) <= M_PAD and C_occ <= C_PAD
    assert Npix <= WIDE and M_total * WIN * WIN <= WIDE
    assert WIDE % LANE == 0 and B_BCE_M + 1 <= B_ROWS

    # one fused, grid-less pallas_call: two lane-dense VMEM slabs in (<110 KiB),
    # one SMEM scalar row out.
    fused = pl.pallas_call(
        functools.partial(
            fused_loss_kernel,
            loss_weights=(loss_coef_class, loss_coef_mask_bce, loss_coef_mask_dice,
                          loss_coef_incidence_nll, loss_coef_incidence_mse,
                          loss_coef_occupancy),
            no_electron_weight=no_electron_weight,
            n_batch=B, hw=HW, n_occ_classes=C_occ),
        out_shape=jax.ShapeDtypeStruct((NUM_OUTPUTS,), jnp.float32),
        in_specs=[pl.BlockSpec(memory_space=pltpu.MemorySpace.VMEM),
                  pl.BlockSpec(memory_space=pltpu.MemorySpace.VMEM)],
        out_specs=pl.BlockSpec(memory_space=pltpu.MemorySpace.SMEM),
    )

    @jax.jit
    def criterion_forward(is_electron_logit, positions, chol, incidence_points,
                          true_seg, bin_dense, por_dense, pred_smask,
                          occ_logits, count_map, local_com_xy, local_inc_xy):
        f32 = jnp.float32

        # ---- narrow buffer: class rows + matched-pair distance rows ---------
        cls_rows = jnp.concatenate(
            [is_electron_logit[None, :], jnp.asarray(cls_const)], axis=0)   # (3, Nq)
        cls_rows = jnp.pad(cls_rows, ((0, 0), (0, LANE - Nq)))

        pts_m = incidence_points[e_global]        # (M, 2) matched electron incidence pts
        ctr_m = positions[q_global]               # (M, 2) matched query centers
        chol_m = chol[q_global]                   # (M, 2, 2)
        dist_rows = jnp.stack([
            pts_m[:, 0], pts_m[:, 1], ctr_m[:, 0], ctr_m[:, 1],
            chol_m[:, 0, 0], chol_m[:, 1, 0], chol_m[:, 1, 1],
            jnp.ones((M_total,), f32),
        ], axis=0)                                # (8, M)
        dist_rows = jnp.pad(dist_rows, ((0, 0), (0, LANE - M_total)))
        buf_a = jnp.pad(jnp.concatenate([cls_rows, dist_rows], axis=0),
                        ((0, A_ROWS - 11), (0, 0)))                         # (16, 128)

        # ---- dice maps: one vectorized reorder gather per map ---------------
        vmask = jnp.asarray(m_valid)[:, None, :]            # (B, 1, M_PAD)

        def reorder(dense, sel, mask=None):                  # -> (M_PAD, B*HW)
            g = jnp.take_along_axis(dense.reshape(B, HW, -1),
                                    jnp.asarray(sel)[:, None, :], axis=2)
            if mask is not None:
                g = g * mask
            return jnp.transpose(g, (2, 0, 1)).reshape(M_PAD, WIDE)

        dice_t = reorder(true_seg, e_sel, vmask)
        dice_z = reorder(por_dense, q_sel)
        dice_m = reorder(pred_smask, q_sel, vmask)

        # ---- occupancy: classes on sublanes, pixels on lanes ----------------
        tgt = count_map[occ_idx[:, 0], occ_idx[:, 1], occ_idx[:, 2]]     # (Npix,)
        onehot = jax.nn.one_hot(tgt, C_occ, dtype=f32)                   # (Npix, C)
        occ_rows = jnp.concatenate([
            jnp.pad(occ_logits.T, ((0, C_PAD - C_occ), (0, WIDE - Npix))),
            jnp.pad(onehot.T, ((0, C_PAD - C_occ), (0, WIDE - Npix))),
        ], axis=0)                                                        # (16, WIDE)

        # ---- windowed BCE gather (== gather_from_sparse_tensor semantics) ---
        rc = jnp.floor(pts_m).astype(jnp.int32)                   # (M, 2)
        rr = rc[:, 0][:, None, None] + off_r[None]                # (M, 7, 7)
        cc = rc[:, 1][:, None, None] + off_c[None]
        inb = ((rr >= 0) & (rr < H) & (cc >= 0) & (cc < W)).astype(f32)
        rrc = jnp.clip(rr, 0, H - 1)
        ccc = jnp.clip(cc, 0, W - 1)
        tvals = true_seg[b_of_match[:, None, None], rrc, ccc, e_local[:, None, None]] * inb
        pvals = bin_dense[b_of_match[:, None, None], rrc, ccc, q_local[:, None, None]] * inb
        nwin = M_total * WIN * WIN
        bce_rows = jnp.stack([
            jnp.pad(pvals.reshape(-1), (0, WIDE - nwin)),
            jnp.pad(tvals.reshape(-1), (0, WIDE - nwin)),
            jnp.asarray(bce_mask_row),
        ], axis=0)                                                        # (3, WIDE)

        buf_b = jnp.pad(
            jnp.concatenate([dice_t, dice_z, dice_m, occ_rows, bce_rows], axis=0),
            ((0, B_ROWS - (3 * M_PAD + 2 * C_PAD + 3)), (0, 0)))          # (48, WIDE)

        out_row = fused(buf_a, buf_b)
        oracle_com_mse = jnp.mean((local_com_xy - local_inc_xy) ** 2)
        return out_row, oracle_com_mse

    out_row, oracle_mse = criterion_forward(
        is_electron_logit, positions, chol, incidence_points,
        jnp.asarray(true_seg), jnp.asarray(bin_dense), jnp.asarray(por_dense),
        jnp.asarray(pred_smask), occ_logits, jnp.asarray(count_map),
        local_com_xy, local_inc_xy)
    jax.block_until_ready(out_row)

    # single D2H fetch for all aux scalars
    res, oracle_val = jax.device_get((out_row, oracle_mse))
    res = np.asarray(res)

    aux_outputs = {
        "class_loss": float(res[O_CLASS_LOSS]), "class_acc": float(res[O_CLASS_ACC]),
        "electron_acc": float(res[O_ELECTRON_ACC]),
        "no_electron_acc": float(res[O_NO_ELECTRON_ACC]),
        "bce_loss": float(res[O_BCE_LOSS]), "binary_acc": float(res[O_BINARY_ACC]),
        "dice_loss": float(res[O_DICE_LOSS]),
        "incidence_nll_loss": float(res[O_NLL_LOSS]),
        "incidence_mse_loss": float(res[O_MSE_LOSS]),
        "oracle_com_mse": float(oracle_val),
        "occupancy_loss": float(res[O_OCC_LOSS]), "occupancy_acc": float(res[O_OCC_ACC]),
        "total_loss": float(res[O_TOTAL_LOSS]),
        "matched_indices": matched_indices,
    }

    assert np.isfinite(aux_outputs["total_loss"])
    assert all(np.isfinite(v) for k, v in aux_outputs.items()
               if k != "matched_indices")
    print("KERNEL_OK")
</pallas_src>

<mosaic_0001>
module attributes {stable_mosaic.version = 11 : i64} {
  func.func @fused_loss_kernel(%arg0: memref<16x128xf32, #tpu.memory_space<vmem>>, %arg1: memref<48x512xf32, #tpu.memory_space<vmem>>, %arg2: memref<12xf32, #tpu.memory_space<smem>>) attributes {dimension_semantics = [], scalar_prefetch = 0 : i64, scratch_operands = 0 : i64, tpu.core_type = #tpu.core_type<tc>} {
    %c0 = arith.constant 0 : index
    %c0_0 = arith.constant 0 : index
    %0 = vector.load %arg0[%c0, %c0_0] : memref<16x128xf32, #tpu.memory_space<vmem>>, vector<1x128xf32>
    %c1 = arith.constant 1 : index
    %c0_1 = arith.constant 0 : index
    %1 = vector.load %arg0[%c1, %c0_1] : memref<16x128xf32, #tpu.memory_space<vmem>>, vector<1x128xf32>
    %c2 = arith.constant 2 : index
    %c0_2 = arith.constant 0 : index
    %2 = vector.load %arg0[%c2, %c0_2] : memref<16x128xf32, #tpu.memory_space<vmem>>, vector<1x128xf32>
    %cst = arith.constant 5.000000e-01 : f32
    %3 = vector.broadcast %cst : f32 to vector<1x128xf32>
    %4 = arith.cmpf ogt, %1, %3 : vector<1x128xf32>
    %cst_3 = arith.constant 1.000000e+00 : f32
    %cst_4 = arith.constant 1.000000e-01 : f32
    %5 = vector.broadcast %cst_3 : f32 to vector<1x128xf32>
    %6 = vector.broadcast %cst_4 : f32 to vector<1x128xf32>
    %7 = arith.select %4, %5, %6 : vector<1x128xi1>, vector<1x128xf32>
    %8 = arith.mulf %7, %2 : vector<1x128xf32>
    %cst_5 = arith.constant 0.000000e+00 : f32
    %9 = vector.broadcast %cst_5 : f32 to vector<1x128xf32>
    %10 = arith.cmpf ogt, %0, %9 : vector<1x128xf32>
    %11 = arith.extui %10 : vector<1x128xi1> to vector<1x128xi32>
    %12 = arith.sitofp %11 : vector<1x128xi32> to vector<1x128xf32>
    %13 = arith.cmpf oeq, %12, %1 : vector<1x128xf32>
    %cst_6 = arith.constant 1.000000e+00 : f32
    %cst_7 = arith.constant 0.000000e+00 : f32
    %14 = vector.broadcast %cst_6 : f32 to vector<1x128xf32>
    %15 = vector.broadcast %cst_7 : f32 to vector<1x128xf32>
    %16 = arith.select %13, %14, %15 : vector<1x128xi1>, vector<1x128xf32>
    %17 = arith.mulf %16, %2 : vector<1x128xf32>
    %c3 = arith.constant 3 : index
    %c0_8 = arith.constant 0 : index
    %18 = vector.load %arg0[%c3, %c0_8] : memref<16x128xf32, #tpu.memory_space<vmem>>, vector<1x128xf32>
    %c4 = arith.constant 4 : index
    %c0_9 = arith.constant 0 : index
    %19 = vector.load %arg0[%c4, %c0_9] : memref<16x128xf32, #tpu.memory_space<vmem>>, vector<1x128xf32>
    %c5 = arith.constant 5 : index
    %c0_10 = arith.constant 0 : index
    %20 = vector.load %arg0[%c5, %c0_10] : memref<16x128xf32, #tpu.memory_space<vmem>>, vector<1x128xf32>
    %c6 = arith.constant 6 : index
    %c0_11 = arith.constant 0 : index
    %21 = vector.load %arg0[%c6, %c0_11] : memref<16x128xf32, #tpu.memory_space<vmem>>, vector<1x128xf32>
    %c7 = arith.constant 7 : index
    %c0_12 = arith.constant 0 : index
    %22 = vector.load %arg0[%c7, %c0_12] : memref<16x128xf32, #tpu.memory_space<vmem>>, vector<1x128xf32>
    %c8 = arith.constant 8 : index
    %c0_13 = arith.constant 0 : index
    %23 = vector.load %arg0[%c8, %c0_13] : memref<16x128xf32, #tpu.memory_space<vmem>>, vector<1x128xf32>
    %c9 = arith.constant 9 : index
    %c0_14 = arith.constant 0 : index
    %24 = vector.load %arg0[%c9, %c0_14] : memref<16x128xf32, #tpu.memory_space<vmem>>, vector<1x128xf32>
    %c10 = arith.constant 10 : index
    %c0_15 = arith.constant 0 : index
    %25 = vector.load %arg0[%c10, %c0_15] : memref<16x128xf32, #tpu.memory_space<vmem>>, vector<1x128xf32>
    %26 = arith.subf %18, %20 : vector<1x128xf32>
    %27 = arith.subf %19, %21 : vector<1x128xf32>
    %cst_16 = arith.constant 0.000000e+00 : f32
    %28 = vector.broadcast %cst_16 : f32 to vector<1x128xf32>
    %29 = arith.cmpf ogt, %25, %28 : vector<1x128xf32>
    %cst_17 = arith.constant 1.000000e+00 : f32
    %30 = vector.broadcast %cst_17 : f32 to vector<1x128xf32>
    %31 = arith.select %29, %22, %30 : vector<1x128xi1>, vector<1x128xf32>
    %cst_18 = arith.constant 0.000000e+00 : f32
    %32 = vector.broadcast %cst_18 : f32 to vector<1x128xf32>
    %33 = arith.cmpf ogt, %25, %32 : vector<1x128xf32>
    %cst_19 = arith.constant 1.000000e+00 : f32
    %34 = vector.broadcast %cst_19 : f32 to vector<1x128xf32>
    %35 = arith.select %33, %24, %34 : vector<1x128xi1>, vector<1x128xf32>
    %36 = arith.divf %26, %31 : vector<1x128xf32>
    %37 = arith.mulf %23, %36 : vector<1x128xf32>
    %38 = arith.subf %27, %37 : vector<1x128xf32>
    %39 = arith.divf %38, %35 : vector<1x128xf32>
    %40 = arith.mulf %36, %36 : vector<1x128xf32>
    %41 = arith.mulf %39, %39 : vector<1x128xf32>
    %42 = arith.addf %40, %41 : vector<1x128xf32>
    %cst_20 = arith.constant 5.000000e-01 : f32
    %43 = vector.broadcast %cst_20 : f32 to vector<1x128xf32>
    %44 = arith.mulf %43, %42 : vector<1x128xf32>
    %45 = math.log %31 : vector<1x128xf32>
    %46 = arith.addf %44, %45 : vector<1x128xf32>
    %47 = math.log %35 : vector<1x128xf32>
    %48 = arith.addf %46, %47 : vector<1x128xf32>
    %cst_21 = arith.constant 1.83787704 : f32
    %49 = vector.broadcast %cst_21 : f32 to vector<1x128xf32>
    %50 = arith.addf %48, %49 : vector<1x128xf32>
    %51 = math.absf %50 : vector<1x128xf32>
    %cst_22 = arith.constant 0x7F800000 : f32
    %52 = vector.broadcast %cst_22 : f32 to vector<1x128xf32>
    %53 = arith.cmpf oeq, %51, %52 : vector<1x128xf32>
    %cst_23 = arith.constant 1.000000e+07 : f32
    %54 = vector.broadcast %cst_23 : f32 to vector<1x128xf32>
    %55 = arith.select %53, %54, %50 : vector<1x128xi1>, vector<1x128xf32>
    %56 = math.absf %0 : vector<1x128xf32>
    %cst_24 = arith.constant 0.000000e+00 : f32
    %57 = vector.broadcast %cst_24 : f32 to vector<1x128xf32>
    %58 = arith.subf %57, %56 : vector<1x128xf32>
    %59 = math.exp %58 : vector<1x128xf32>
    %cst_25 = arith.constant 9.99999974E-5 : f32
    %60 = vector.broadcast %cst_25 : f32 to vector<1x128xf32>
    %61 = arith.cmpf olt, %59, %60 : vector<1x128xf32>
    %cst_26 = arith.constant 5.000000e-01 : f32
    %62 = vector.broadcast %cst_26 : f32 to vector<1x128xf32>
    %63 = arith.mulf %62, %59 : vector<1x128xf32>
    %cst_27 = arith.constant 1.000000e+00 : f32
    %64 = vector.broadcast %cst_27 : f32 to vector<1x128xf32>
    %65 = arith.subf %64, %63 : vector<1x128xf32>
    %66 = arith.mulf %59, %65 : vector<1x128xf32>
    %cst_28 = arith.constant 1.000000e+00 : f32
    %67 = vector.broadcast %cst_28 : f32 to vector<1x128xf32>
    %68 = arith.addf %67, %59 : vector<1x128xf32>
    %69 = math.log %68 : vector<1x128xf32>
    %70 = arith.select %61, %66, %69 : vector<1x128xi1>, vector<1x128xf32>
    %cst_29 = arith.constant 0.000000e+00 : f32
    %71 = vector.broadcast %cst_29 : f32 to vector<1x128xf32>
    %72 = arith.maximumf %0, %71 : vector<1x128xf32>
    %73 = arith.mulf %0, %1 : vector<1x128xf32>
    %74 = arith.subf %72, %73 : vector<1x128xf32>
    %75 = arith.addf %74, %70 : vector<1x128xf32>
    %76 = arith.mulf %8, %75 : vector<1x128xf32>
    %77 = arith.mulf %1, %2 : vector<1x128xf32>
    %78 = arith.mulf %17, %1 : vector<1x128xf32>
    %79 = arith.mulf %55, %25 : vector<1x128xf32>
    %80 = arith.mulf %26, %26 : vector<1x128xf32>
    %81 = arith.mulf %27, %27 : vector<1x128xf32>
    %82 = arith.addf %80, %81 : vector<1x128xf32>
    %83 = arith.mulf %82, %25 : vector<1x128xf32>
    %84 = tpu.iota {dimensions = array<i32: 0>} : vector<8x128xi32>
    %cst_30 = arith.constant 0.000000e+00 : f32
    %85 = vector.broadcast %cst_30 : f32 to vector<8x128xf32>
    %c0_i32 = arith.constant 0 : i32
    %86 = vector.broadcast %c0_i32 : i32 to vector<8x128xi32>
    %87 = arith.cmpi eq, %84, %86 : vector<8x128xi32>
    %cst_31 = arith.constant 0.000000e+00 : f32
    %88 = vector.shape_cast %76 : vector<1x128xf32> to vector<1x128xf32>
    %89 = vector.broadcast %88 : vector<1x128xf32> to vector<8x128xf32>
    %90 = vector.broadcast %cst_31 : f32 to vector<8x128xf32>
    %91 = arith.select %87, %89, %90 : vector<8x128xi1>, vector<8x128xf32>
    %92 = arith.addf %85, %91 : vector<8x128xf32>
    %c1_i32 = arith.constant 1 : i32
    %93 = vector.broadcast %c1_i32 : i32 to vector<8x128xi32>
    %94 = arith.cmpi eq, %84, %93 : vector<8x128xi32>
    %cst_32 = arith.constant 0.000000e+00 : f32
    %95 = vector.shape_cast %2 : vector<1x128xf32> to vector<1x128xf32>
    %96 = vector.broadcast %95 : vector<1x128xf32> to vector<8x128xf32>
    %97 = vector.broadcast %cst_32 : f32 to vector<8x128xf32>
    %98 = arith.select %94, %96, %97 : vector<8x128xi1>, vector<8x128xf32>
    %99 = arith.addf %92, %98 : vector<8x128xf32>
    %c2_i32 = arith.constant 2 : i32
    %100 = vector.broadcast %c2_i32 : i32 to vector<8x128xi32>
    %101 = arith.cmpi eq, %84, %100 : vector<8x128xi32>
    %cst_33 = arith.constant 0.000000e+00 : f32
    %102 = vector.shape_cast %17 : vector<1x128xf32> to vector<1x128xf32>
    %103 = vector.broadcast %102 : vector<1x128xf32> to vector<8x128xf32>
    %104 = vector.broadcast %cst_33 : f32 to vector<8x128xf32>
    %105 = arith.select %101, %103, %104 : vector<8x128xi1>, vector<8x128xf32>
    %106 = arith.addf %99, %105 : vector<8x128xf32>
    %c3_i32 = arith.constant 3 : i32
    %107 = vector.broadcast %c3_i32 : i32 to vector<8x128xi32>
    %108 = arith.cmpi eq, %84, %107 : vector<8x128xi32>
    %cst_34 = arith.constant 0.000000e+00 : f32
    %109 = vector.shape_cast %77 : vector<1x128xf32> to vector<1x128xf32>
    %110 = vector.broadcast %109 : vector<1x128xf32> to vector<8x128xf32>
    %111 = vector.broadcast %cst_34 : f32 to vector<8x128xf32>
    %112 = arith.select %108, %110, %111 : vector<8x128xi1>, vector<8x128xf32>
    %113 = arith.addf %106, %112 : vector<8x128xf32>
    %c4_i32 = arith.constant 4 : i32
    %114 = vector.broadcast %c4_i32 : i32 to vector<8x128xi32>
    %115 = arith.cmpi eq, %84, %114 : vector<8x128xi32>
    %cst_35 = arith.constant 0.000000e+00 : f32
    %116 = vector.shape_cast %78 : vector<1x128xf32> to vector<1x128xf32>
    %117 = vector.broadcast %116 : vector<1x128xf32> to vector<8x128xf32>
    %118 = vector.broadcast %cst_35 : f32 to vector<8x128xf32>
    %119 = arith.select %115, %117, %118 : vector<8x128xi1>, vector<8x128xf32>
    %120 = arith.addf %113, %119 : vector<8x128xf32>
    %c5_i32 = arith.constant 5 : i32
    %121 = vector.broadcast %c5_i32 : i32 to vector<8x128xi32>
    %122 = arith.cmpi eq, %84, %121 : vector<8x128xi32>
    %cst_36 = arith.constant 0.000000e+00 : f32
    %123 = vector.shape_cast %79 : vector<1x128xf32> to vector<1x128xf32>
    %124 = vector.broadcast %123 : vector<1x128xf32> to vector<8x128xf32>
    %125 = vector.broadcast %cst_36 : f32 to vector<8x128xf32>
    %126 = arith.select %122, %124, %125 : vector<8x128xi1>, vector<8x128xf32>
    %127 = arith.addf %120, %126 : vector<8x128xf32>
    %c6_i32 = arith.constant 6 : i32
    %128 = vector.broadcast %c6_i32 : i32 to vector<8x128xi32>
    %129 = arith.cmpi eq, %84, %128 : vector<8x128xi32>
    %cst_37 = arith.constant 0.000000e+00 : f32
    %130 = vector.shape_cast %25 : vector<1x128xf32> to vector<1x128xf32>
    %131 = vector.broadcast %130 : vector<1x128xf32> to vector<8x128xf32>
    %132 = vector.broadcast %cst_37 : f32 to vector<8x128xf32>
    %133 = arith.select %129, %131, %132 : vector<8x128xi1>, vector<8x128xf32>
    %134 = arith.addf %127, %133 : vector<8x128xf32>
    %c7_i32 = arith.constant 7 : i32
    %135 = vector.broadcast %c7_i32 : i32 to vector<8x128xi32>
    %136 = arith.cmpi eq, %84, %135 : vector<8x128xi32>
    %cst_38 = arith.constant 0.000000e+00 : f32
    %137 = vector.shape_cast %83 : vector<1x128xf32> to vector<1x128xf32>
    %138 = vector.broadcast %137 : vector<1x128xf32> to vector<8x128xf32>
    %139 = vector.broadcast %cst_38 : f32 to vector<8x128xf32>
    %140 = arith.select %136, %138, %139 : vector<8x128xi1>, vector<8x128xf32>
    %141 = arith.addf %134, %140 : vector<8x128xf32>
    %cst_39 = arith.constant dense<0.000000e+00> : vector<8xf32>
    %142 = vector.multi_reduction <add>, %141, %cst_39 [1] : vector<8x128xf32> to vector<8xf32>
    %143 = vector.shape_cast %142 : vector<8xf32> to vector<8x1xf32>
    %c0_40 = arith.constant 0 : index
    %c0_41 = arith.constant 0 : index
    %144 = vector.load %arg1[%c0_40, %c0_41] : memref<48x512xf32, #tpu.memory_space<vmem>>, vector<8x512xf32>
    %c8_42 = arith.constant 8 : index
    %c0_43 = arith.constant 0 : index
    %145 = vector.load %arg1[%c8_42, %c0_43] : memref<48x512xf32, #tpu.memory_space<vmem>>, vector<8x512xf32>
    %c16 = arith.constant 16 : index
    %c0_44 = arith.constant 0 : index
    %146 = vector.load %arg1[%c16, %c0_44] : memref<48x512xf32, #tpu.memory_space<vmem>>, vector<8x512xf32>
    %c24 = arith.constant 24 : index
    %c0_45 = arith.constant 0 : index
    %147 = vector.load %arg1[%c24, %c0_45] : memref<48x512xf32, #tpu.memory_space<vmem>>, vector<8x512xf32>
    %c32 = arith.constant 32 : index
    %c0_46 = arith.constant 0 : index
    %148 = vector.load %arg1[%c32, %c0_46] : memref<48x512xf32, #tpu.memory_space<vmem>>, vector<8x512xf32>
    %c40 = arith.constant 40 : index
    %c0_47 = arith.constant 0 : index
    %149 = vector.load %arg1[%c40, %c0_47] : memref<48x512xf32, #tpu.memory_space<vmem>>, vector<1x512xf32>
    %c41 = arith.constant 41 : index
    %c0_48 = arith.constant 0 : index
    %150 = vector.load %arg1[%c41, %c0_48] : memref<48x512xf32, #tpu.memory_space<vmem>>, vector<1x512xf32>
    %c42 = arith.constant 42 : index
    %c0_49 = arith.constant 0 : index
    %151 = vector.load %arg1[%c42, %c0_49] : memref<48x512xf32, #tpu.memory_space<vmem>>, vector<1x512xf32>
    %152 = tpu.iota {dimensions = array<i32: 0>} : vector<8x512xi32>
    %c4_i32_50 = arith.constant 4 : i32
    %153 = vector.broadcast %c4_i32_50 : i32 to vector<8x512xi32>
    %154 = arith.cmpi slt, %152, %153 : vector<8x512xi32>
    %155 = arith.extui %154 : vector<8x512xi1> to vector<8x512xi32>
    %156 = arith.sitofp %155 : vector<8x512xi32> to vector<8x512xf32>
    %157 = arith.sitofp %152 : vector<8x512xi32> to vector<8x512xf32>
    %c0_i32_51 = arith.constant 0 : i32
    %158 = vector.broadcast %c0_i32_51 : i32 to vector<8x512xi32>
    %159 = arith.cmpi eq, %152, %158 : vector<8x512xi32>
    %cst_52 = arith.constant 1.000000e-01 : f32
    %cst_53 = arith.constant 1.000000e+00 : f32
    %160 = vector.broadcast %cst_52 : f32 to vector<8x512xf32>
    %161 = vector.broadcast %cst_53 : f32 to vector<8x512xf32>
    %162 = arith.select %159, %160, %161 : vector<8x512xi1>, vector<8x512xf32>
    %163 = arith.mulf %162, %156 : vector<8x512xf32>
    %cst_54 = arith.constant 0.000000e+00 : f32
    %164 = vector.broadcast %cst_54 : f32 to vector<8x512xf32>
    %165 = arith.cmpf ogt, %146, %164 : vector<8x512xf32>
    %cst_55 = arith.constant -1.000000e+30 : f32
    %166 = vector.broadcast %cst_55 : f32 to vector<8x512xf32>
    %167 = arith.select %165, %145, %166 : vector<8x512xi1>, vector<8x512xf32>
    %cst_56 = arith.constant -1.000000e+30 : f32
    %168 = vector.broadcast %cst_56 : f32 to vector<8x512xf32>
    %169 = arith.select %154, %147, %168 : vector<8x512xi1>, vector<8x512xf32>
    %170 = tpu.concatenate %167, %169 in 1 : vector<8x512xf32>, vector<8x512xf32> -> vector<8x1024xf32>
    %cst_57 = arith.constant dense<0xFF800000> : vector<1024xf32>
    %171 = vector.multi_reduction <maximumf>, %170, %cst_57 [0] : vector<8x1024xf32> to vector<1024xf32>
    %172 = vector.shape_cast %171 : vector<1024xf32> to vector<1x1024xf32>
    %173 = vector.extract_strided_slice %172 {offsets = [0, 0], sizes = [1, 512], strides = [1, 1]} : vector<1x1024xf32> to vector<1x512xf32>
    %174 = vector.extract_strided_slice %172 {offsets = [0, 512], sizes = [1, 512], strides = [1, 1]} : vector<1x1024xf32> to vector<1x512xf32>
    %cst_58 = arith.constant 5.000000e-01 : f32
    %cst_59 = arith.constant -1.000000e+30 : f32
    %175 = arith.mulf %cst_58, %cst_59 : f32
    %176 = vector.broadcast %175 : f32 to vector<1x512xf32>
    %177 = arith.cmpf ogt, %173, %176 : vector<1x512xf32>
    %cst_60 = arith.constant 0.000000e+00 : f32
    %178 = vector.broadcast %cst_60 : f32 to vector<1x512xf32>
    %179 = arith.select %177, %173, %178 : vector<1x512xi1>, vector<1x512xf32>
    %180 = tpu.concatenate %179, %174 in 1 : vector<1x512xf32>, vector<1x512xf32> -> vector<1x1024xf32>
    %181 = vector.broadcast %180 : vector<1x1024xf32> to vector<8x1024xf32>
    %182 = arith.subf %170, %181 : vector<8x1024xf32>
    %183 = math.exp %182 : vector<8x1024xf32>
    %cst_61 = arith.constant dense<0.000000e+00> : vector<1024xf32>
    %184 = vector.multi_reduction <add>, %183, %cst_61 [0] : vector<8x1024xf32> to vector<1024xf32>
    %185 = vector.shape_cast %184 : vector<1024xf32> to vector<1x1024xf32>
    %186 = vector.extract_strided_slice %183 {offsets = [0, 0], sizes = [8, 512], strides = [1, 1]} : vector<8x1024xf32> to vector<8x512xf32>
    %187 = vector.extract_strided_slice %185 {offsets = [0, 0], sizes = [1, 512], strides = [1, 1]} : vector<1x1024xf32> to vector<1x512xf32>
    %188 = vector.extract_strided_slice %185 {offsets = [0, 512], sizes = [1, 512], strides = [1, 1]} : vector<1x1024xf32> to vector<1x512xf32>
    %cst_62 = arith.constant 0.000000e+00 : f32
    %189 = vector.broadcast %cst_62 : f32 to vector<1x512xf32>
    %190 = arith.cmpf ogt, %187, %189 : vector<1x512xf32>
    %cst_63 = arith.constant 1.000000e+00 : f32
    %191 = vector.broadcast %cst_63 : f32 to vector<1x512xf32>
    %192 = arith.select %190, %187, %191 : vector<1x512xi1>, vector<1x512xf32>
    %193 = tpu.reciprocal %192 {approx = true} : vector<1x512xf32> -> vector<1x512xf32>
    %194 = vector.broadcast %193 : vector<1x512xf32> to vector<8x512xf32>
    %195 = arith.mulf %186, %194 : vector<8x512xf32>
    %196 = math.log %188 : vector<1x512xf32>
    %197 = arith.addf %174, %196 : vector<1x512xf32>
    %cst_64 = arith.constant 2.000000e+00 : f32
    %198 = vector.broadcast %cst_64 : f32 to vector<8x512xf32>
    %199 = arith.mulf %198, %144 : vector<8x512xf32>
    %200 = arith.mulf %199, %195 : vector<8x512xf32>
    %201 = arith.addf %144, %195 : vector<8x512xf32>
    %202 = vector.broadcast %197 : vector<1x512xf32> to vector<8x512xf32>
    %203 = arith.subf %147, %202 : vector<8x512xf32>
    %204 = arith.mulf %148, %203 : vector<8x512xf32>
    %205 = arith.mulf %148, %163 : vector<8x512xf32>
    %206 = arith.mulf %148, %157 : vector<8x512xf32>
    %207 = tpu.concatenate %200, %201, %204, %205, %148, %206 in 1 : vector<8x512xf32>, vector<8x512xf32>, vector<8x512xf32>, vector<8x512xf32>, vector<8x512xf32>, vector<8x512xf32> -> vector<8x3072xf32>
    %cst_65 = arith.constant dense<0.000000e+00> : vector<3072xf32>
    %208 = vector.multi_reduction <add>, %207, %cst_65 [0] : vector<8x3072xf32> to vector<3072xf32>
    %209 = vector.shape_cast %208 : vector<3072xf32> to vector<1x3072xf32>
    %210 = vector.extract_strided_slice %209 {offsets = [0, 0], sizes = [1, 512], strides = [1, 1]} : vector<1x3072xf32> to vector<1x512xf32>
    %211 = vector.extract_strided_slice %209 {offsets = [0, 512], sizes = [1, 512], strides = [1, 1]} : vector<1x3072xf32> to vector<1x512xf32>
    %212 = vector.extract_strided_slice %209 {offsets = [0, 1024], sizes = [1, 512], strides = [1, 1]} : vector<1x3072xf32> to vector<1x512xf32>
    %213 = vector.extract_strided_slice %209 {offsets = [0, 1536], sizes = [1, 512], strides = [1, 1]} : vector<1x3072xf32> to vector<1x512xf32>
    %214 = vector.extract_strided_slice %209 {offsets = [0, 2048], sizes = [1, 512], strides = [1, 1]} : vector<1x3072xf32> to vector<1x512xf32>
    %215 = vector.extract_strided_slice %209 {offsets = [0, 2560], sizes = [1, 512], strides = [1, 1]} : vector<1x3072xf32> to vector<1x512xf32>
    %216 = vector.broadcast %174 : vector<1x512xf32> to vector<8x512xf32>
    %217 = arith.cmpf oeq, %169, %216 : vector<8x512xf32>
    %cst_66 = arith.constant 1.000000e+09 : f32
    %218 = vector.broadcast %cst_66 : f32 to vector<8x512xf32>
    %219 = arith.select %217, %157, %218 : vector<8x512xi1>, vector<8x512xf32>
    %cst_67 = arith.constant dense<0x7F800000> : vector<512xf32>
    %220 = vector.multi_reduction <minimumf>, %219, %cst_67 [0] : vector<8x512xf32> to vector<512xf32>
    %221 = vector.shape_cast %220 : vector<512xf32> to vector<1x512xf32>
    %222 = arith.cmpf oeq, %221, %215 : vector<1x512xf32>
    %cst_68 = arith.constant 1.000000e+00 : f32
    %cst_69 = arith.constant 0.000000e+00 : f32
    %223 = vector.broadcast %cst_68 : f32 to vector<1x512xf32>
    %224 = vector.broadcast %cst_69 : f32 to vector<1x512xf32>
    %225 = arith.select %222, %223, %224 : vector<1x512xi1>, vector<1x512xf32>
    %226 = arith.mulf %225, %214 : vector<1x512xf32>
    %cst_70 = arith.constant 0.000000e+00 : f32
    %227 = vector.broadcast %cst_70 : f32 to vector<1x512xf32>
    %228 = arith.cmpf ogt, %149, %227 : vector<1x512xf32>
    %229 = arith.extui %228 : vector<1x512xi1> to vector<1x512xi32>
    %230 = arith.sitofp %229 : vector<1x512xi32> to vector<1x512xf32>
    %231 = arith.cmpf oeq, %230, %150 : vector<1x512xf32>
    %cst_71 = arith.constant 1.000000e+00 : f32
    %cst_72 = arith.constant 0.000000e+00 : f32
    %232 = vector.broadcast %cst_71 : f32 to vector<1x512xf32>
    %233 = vector.broadcast %cst_72 : f32 to vector<1x512xf32>
    %234 = arith.select %231, %232, %233 : vector<1x512xi1>, vector<1x512xf32>
    %235 = arith.mulf %234, %151 : vector<1x512xf32>
    %236 = tpu.iota {dimensions = array<i32: 1>} : vector<1x512xi32>
    %c0_i32_73 = arith.constant 0 : i32
    %237 = vector.broadcast %c0_i32_73 : i32 to vector<1x512xi32>
    %238 = arith.cmpi sge, %236, %237 : vector<1x512xi32>
    %c256_i32 = arith.constant 256 : i32
    %239 = vector.broadcast %c256_i32 : i32 to vector<1x512xi32>
    %240 = arith.cmpi slt, %236, %239 : vector<1x512xi32>
    %241 = arith.andi %238, %240 : vector<1x512xi1>
    %242 = arith.extui %241 : vector<1x512xi1> to vector<1x512xi32>
    %243 = arith.sitofp %242 : vector<1x512xi32> to vector<1x512xf32>
    %244 = arith.mulf %210, %243 : vector<1x512xf32>
    %245 = arith.mulf %211, %243 : vector<1x512xf32>
    %c256_i32_74 = arith.constant 256 : i32
    %246 = vector.broadcast %c256_i32_74 : i32 to vector<1x512xi32>
    %247 = arith.cmpi sge, %236, %246 : vector<1x512xi32>
    %c512_i32 = arith.constant 512 : i32
    %248 = vector.broadcast %c512_i32 : i32 to vector<1x512xi32>
    %249 = arith.cmpi slt, %236, %248 : vector<1x512xi32>
    %250 = arith.andi %247, %249 : vector<1x512xi1>
    %251 = arith.extui %250 : vector<1x512xi1> to vector<1x512xi32>
    %252 = arith.sitofp %251 : vector<1x512xi32> to vector<1x512xf32>
    %253 = arith.mulf %210, %252 : vector<1x512xf32>
    %254 = arith.mulf %211, %252 : vector<1x512xf32>
    %255 = math.absf %149 : vector<1x512xf32>
    %cst_75 = arith.constant 0.000000e+00 : f32
    %256 = vector.broadcast %cst_75 : f32 to vector<1x512xf32>
    %257 = arith.subf %256, %255 : vector<1x512xf32>
    %258 = math.exp %257 : vector<1x512xf32>
    %cst_76 = arith.constant 9.99999974E-5 : f32
    %259 = vector.broadcast %cst_76 : f32 to vector<1x512xf32>
    %260 = arith.cmpf olt, %258, %259 : vector<1x512xf32>
    %cst_77 = arith.constant 5.000000e-01 : f32
    %261 = vector.broadcast %cst_77 : f32 to vector<1x512xf32>
    %262 = arith.mulf %261, %258 : vector<1x512xf32>
    %cst_78 = arith.constant 1.000000e+00 : f32
    %263 = vector.broadcast %cst_78 : f32 to vector<1x512xf32>
    %264 = arith.subf %263, %262 : vector<1x512xf32>
    %265 = arith.mulf %258, %264 : vector<1x512xf32>
    %cst_79 = arith.constant 1.000000e+00 : f32
    %266 = vector.broadcast %cst_79 : f32 to vector<1x512xf32>
    %267 = arith.addf %266, %258 : vector<1x512xf32>
    %268 = math.log %267 : vector<1x512xf32>
    %269 = arith.select %260, %265, %268 : vector<1x512xi1>, vector<1x512xf32>
    %cst_80 = arith.constant 0.000000e+00 : f32
    %270 = vector.broadcast %cst_80 : f32 to vector<1x512xf32>
    %271 = arith.maximumf %149, %270 : vector<1x512xf32>
    %272 = arith.mulf %149, %150 : vector<1x512xf32>
    %273 = arith.subf %271, %272 : vector<1x512xf32>
    %274 = arith.addf %273, %269 : vector<1x512xf32>
    %275 = arith.mulf %274, %151 : vector<1x512xf32>
    %cst_81 = arith.constant 0.000000e+00 : f32
    %276 = vector.broadcast %cst_81 : f32 to vector<1x512xf32>
    %277 = arith.subf %276, %212 : vector<1x512xf32>
    %278 = arith.mulf %277, %213 : vector<1x512xf32>
    %279 = tpu.iota {dimensions = array<i32: 0>} : vector<11x512xi32>
    %cst_82 = arith.constant 0.000000e+00 : f32
    %280 = vector.broadcast %cst_82 : f32 to vector<11x512xf32>
    %c0_i32_83 = arith.constant 0 : i32
    %281 = vector.broadcast %c0_i32_83 : i32 to vector<11x512xi32>
    %282 = arith.cmpi eq, %279, %281 : vector<11x512xi32>
    %cst_84 = arith.constant 0.000000e+00 : f32
    %283 = vector.shape_cast %275 : vector<1x512xf32> to vector<1x512xf32>
    %284 = vector.broadcast %283 : vector<1x512xf32> to vector<11x512xf32>
    %285 = vector.broadcast %cst_84 : f32 to vector<11x512xf32>
    %286 = arith.select %282, %284, %285 : vector<11x512xi1>, vector<11x512xf32>
    %287 = arith.addf %280, %286 : vector<11x512xf32>
    %c1_i32_85 = arith.constant 1 : i32
    %288 = vector.broadcast %c1_i32_85 : i32 to vector<11x512xi32>
    %289 = arith.cmpi eq, %279, %288 : vector<11x512xi32>
    %cst_86 = arith.constant 0.000000e+00 : f32
    %290 = vector.shape_cast %151 : vector<1x512xf32> to vector<1x512xf32>
    %291 = vector.broadcast %290 : vector<1x512xf32> to vector<11x512xf32>
    %292 = vector.broadcast %cst_86 : f32 to vector<11x512xf32>
    %293 = arith.select %289, %291, %292 : vector<11x512xi1>, vector<11x512xf32>
    %294 = arith.addf %287, %293 : vector<11x512xf32>
    %c2_i32_87 = arith.constant 2 : i32
    %295 = vector.broadcast %c2_i32_87 : i32 to vector<11x512xi32>
    %296 = arith.cmpi eq, %279, %295 : vector<11x512xi32>
    %cst_88 = arith.constant 0.000000e+00 : f32
    %297 = vector.shape_cast %235 : vector<1x512xf32> to vector<1x512xf32>
    %298 = vector.broadcast %297 : vector<1x512xf32> to vector<11x512xf32>
    %299 = vector.broadcast %cst_88 : f32 to vector<11x512xf32>
    %300 = arith.select %296, %298, %299 : vector<11x512xi1>, vector<11x512xf32>
    %301 = arith.addf %294, %300 : vector<11x512xf32>
    %c3_i32_89 = arith.constant 3 : i32
    %302 = vector.broadcast %c3_i32_89 : i32 to vector<11x512xi32>
    %303 = arith.cmpi eq, %279, %302 : vector<11x512xi32>
    %cst_90 = arith.constant 0.000000e+00 : f32
    %304 = vector.shape_cast %278 : vector<1x512xf32> to vector<1x512xf32>
    %305 = vector.broadcast %304 : vector<1x512xf32> to vector<11x512xf32>
    %306 = vector.broadcast %cst_90 : f32 to vector<11x512xf32>
    %307 = arith.select %303, %305, %306 : vector<11x512xi1>, vector<11x512xf32>
    %308 = arith.addf %301, %307 : vector<11x512xf32>
    %c4_i32_91 = arith.constant 4 : i32
    %309 = vector.broadcast %c4_i32_91 : i32 to vector<11x512xi32>
    %310 = arith.cmpi eq, %279, %309 : vector<11x512xi32>
    %cst_92 = arith.constant 0.000000e+00 : f32
    %311 = vector.shape_cast %213 : vector<1x512xf32> to vector<1x512xf32>
    %312 = vector.broadcast %311 : vector<1x512xf32> to vector<11x512xf32>
    %313 = vector.broadcast %cst_92 : f32 to vector<11x512xf32>
    %314 = arith.select %310, %312, %313 : vector<11x512xi1>, vector<11x512xf32>
    %315 = arith.addf %308, %314 : vector<11x512xf32>
    %c5_i32_93 = arith.constant 5 : i32
    %316 = vector.broadcast %c5_i32_93 : i32 to vector<11x512xi32>
    %317 = arith.cmpi eq, %279, %316 : vector<11x512xi32>
    %cst_94 = arith.constant 0.000000e+00 : f32
    %318 = vector.shape_cast %226 : vector<1x512xf32> to vector<1x512xf32>
    %319 = vector.broadcast %318 : vector<1x512xf32> to vector<11x512xf32>
    %320 = vector.broadcast %cst_94 : f32 to vector<11x512xf32>
    %321 = arith.select %317, %319, %320 : vector<11x512xi1>, vector<11x512xf32>
    %322 = arith.addf %315, %321 : vector<11x512xf32>
    %c6_i32_95 = arith.constant 6 : i32
    %323 = vector.broadcast %c6_i32_95 : i32 to vector<11x512xi32>
    %324 = arith.cmpi eq, %279, %323 : vector<11x512xi32>
    %cst_96 = arith.constant 0.000000e+00 : f32
    %325 = vector.shape_cast %214 : vector<1x512xf32> to vector<1x512xf32>
    %326 = vector.broadcast %325 : vector<1x512xf32> to vector<11x512xf32>
    %327 = vector.broadcast %cst_96 : f32 to vector<11x512xf32>
    %328 = arith.select %324, %326, %327 : vector<11x512xi1>, vector<11x512xf32>
    %329 = arith.addf %322, %328 : vector<11x512xf32>
    %c7_i32_97 = arith.constant 7 : i32
    %330 = vector.broadcast %c7_i32_97 : i32 to vector<11x512xi32>
    %331 = arith.cmpi eq, %279, %330 : vector<11x512xi32>
    %cst_98 = arith.constant 0.000000e+00 : f32
    %332 = vector.shape_cast %244 : vector<1x512xf32> to vector<1x512xf32>
    %333 = vector.broadcast %332 : vector<1x512xf32> to vector<11x512xf32>
    %334 = vector.broadcast %cst_98 : f32 to vector<11x512xf32>
    %335 = arith.select %331, %333, %334 : vector<11x512xi1>, vector<11x512xf32>
    %336 = arith.addf %329, %335 : vector<11x512xf32>
    %c8_i32 = arith.constant 8 : i32
    %337 = vector.broadcast %c8_i32 : i32 to vector<11x512xi32>
    %338 = arith.cmpi eq, %279, %337 : vector<11x512xi32>
    %cst_99 = arith.constant 0.000000e+00 : f32
    %339 = vector.shape_cast %245 : vector<1x512xf32> to vector<1x512xf32>
    %340 = vector.broadcast %339 : vector<1x512xf32> to vector<11x512xf32>
    %341 = vector.broadcast %cst_99 : f32 to vector<11x512xf32>
    %342 = arith.select %338, %340, %341 : vector<11x512xi1>, vector<11x512xf32>
    %343 = arith.addf %336, %342 : vector<11x512xf32>
    %c9_i32 = arith.constant 9 : i32
    %344 = vector.broadcast %c9_i32 : i32 to vector<11x512xi32>
    %345 = arith.cmpi eq, %279, %344 : vector<11x512xi32>
    %cst_100 = arith.constant 0.000000e+00 : f32
    %346 = vector.shape_cast %253 : vector<1x512xf32> to vector<1x512xf32>
    %347 = vector.broadcast %346 : vector<1x512xf32> to vector<11x512xf32>
    %348 = vector.broadcast %cst_100 : f32 to vector<11x512xf32>
    %349 = arith.select %345, %347, %348 : vector<11x512xi1>, vector<11x512xf32>
    %350 = arith.addf %343, %349 : vector<11x512xf32>
    %c10_i32 = arith.constant 10 : i32
    %351 = vector.broadcast %c10_i32 : i32 to vector<11x512xi32>
    %352 = arith.cmpi eq, %279, %351 : vector<11x512xi32>
    %cst_101 = arith.constant 0.000000e+00 : f32
    %353 = vector.shape_cast %254 : vector<1x512xf32> to vector<1x512xf32>
    %354 = vector.broadcast %353 : vector<1x512xf32> to vector<11x512xf32>
    %355 = vector.broadcast %cst_101 : f32 to vector<11x512xf32>
    %356 = arith.select %352, %354, %355 : vector<11x512xi1>, vector<11x512xf32>
    %357 = arith.addf %350, %356 : vector<11x512xf32>
    %cst_102 = arith.constant dense<0.000000e+00> : vector<11xf32>
    %358 = vector.multi_reduction <add>, %357, %cst_102 [1] : vector<11x512xf32> to vector<11xf32>
    %359 = vector.shape_cast %358 : vector<11xf32> to vector<11x1xf32>
    %360 = tpu.iota {dimensions = array<i32: 0>} : vector<8x1xi32>
    %c0_i32_103 = arith.constant 0 : i32
    %361 = vector.broadcast %c0_i32_103 : i32 to vector<8x1xi32>
    %362 = arith.cmpi eq, %360, %361 : vector<8x1xi32>
    %cst_104 = arith.constant 0.000000e+00 : f32
    %363 = vector.broadcast %cst_104 : f32 to vector<8x1xf32>
    %364 = arith.select %362, %143, %363 : vector<8x1xi1>, vector<8x1xf32>
    %365 = vector.shape_cast %364 : vector<8x1xf32> to vector<1x8x1xf32>
    %cst_105 = arith.constant dense<0.000000e+00> : vector<1xf32>
    %366 = vector.multi_reduction <add>, %365, %cst_105 [1, 2] : vector<1x8x1xf32> to vector<1xf32>
    %367 = vector.shape_cast %366 : vector<1xf32> to vector<1x1x1xf32>
    %368 = vector.extract %367[0, 0, 0] : f32 from vector<1x1x1xf32>
    %369 = tpu.iota {dimensions = array<i32: 0>} : vector<8x1xi32>
    %c1_i32_106 = arith.constant 1 : i32
    %370 = vector.broadcast %c1_i32_106 : i32 to vector<8x1xi32>
    %371 = arith.cmpi eq, %369, %370 : vector<8x1xi32>
    %cst_107 = arith.constant 0.000000e+00 : f32
    %372 = vector.broadcast %cst_107 : f32 to vector<8x1xf32>
    %373 = arith.select %371, %143, %372 : vector<8x1xi1>, vector<8x1xf32>
    %374 = vector.shape_cast %373 : vector<8x1xf32> to vector<1x8x1xf32>
    %cst_108 = arith.constant dense<0.000000e+00> : vector<1xf32>
    %375 = vector.multi_reduction <add>, %374, %cst_108 [1, 2] : vector<1x8x1xf32> to vector<1xf32>
    %376 = vector.shape_cast %375 : vector<1xf32> to vector<1x1x1xf32>
    %377 = vector.extract %376[0, 0, 0] : f32 from vector<1x1x1xf32>
    %378 = tpu.iota {dimensions = array<i32: 0>} : vector<8x1xi32>
    %c2_i32_109 = arith.constant 2 : i32
    %379 = vector.broadcast %c2_i32_109 : i32 to vector<8x1xi32>
    %380 = arith.cmpi eq, %378, %379 : vector<8x1xi32>
    %cst_110 = arith.constant 0.000000e+00 : f32
    %381 = vector.broadcast %cst_110 : f32 to vector<8x1xf32>
    %382 = arith.select %380, %143, %381 : vector<8x1xi1>, vector<8x1xf32>
    %383 = vector.shape_cast %382 : vector<8x1xf32> to vector<1x8x1xf32>
    %cst_111 = arith.constant dense<0.000000e+00> : vector<1xf32>
    %384 = vector.multi_reduction <add>, %383, %cst_111 [1, 2] : vector<1x8x1xf32> to vector<1xf32>
    %385 = vector.shape_cast %384 : vector<1xf32> to vector<1x1x1xf32>
    %386 = vector.extract %385[0, 0, 0] : f32 from vector<1x1x1xf32>
    %387 = tpu.iota {dimensions = array<i32: 0>} : vector<8x1xi32>
    %c3_i32_112 = arith.constant 3 : i32
    %388 = vector.broadcast %c3_i32_112 : i32 to vector<8x1xi32>
    %389 = arith.cmpi eq, %387, %388 : vector<8x1xi32>
    %cst_113 = arith.constant 0.000000e+00 : f32
    %390 = vector.broadcast %cst_113 : f32 to vector<8x1xf32>
    %391 = arith.select %389, %143, %390 : vector<8x1xi1>, vector<8x1xf32>
    %392 = vector.shape_cast %391 : vector<8x1xf32> to vector<1x8x1xf32>
    %cst_114 = arith.constant dense<0.000000e+00> : vector<1xf32>
    %393 = vector.multi_reduction <add>, %392, %cst_114 [1, 2] : vector<1x8x1xf32> to vector<1xf32>
    %394 = vector.shape_cast %393 : vector<1xf32> to vector<1x1x1xf32>
    %395 = vector.extract %394[0, 0, 0] : f32 from vector<1x1x1xf32>
    %396 = tpu.iota {dimensions = array<i32: 0>} : vector<8x1xi32>
    %c4_i32_115 = arith.constant 4 : i32
    %397 = vector.broadcast %c4_i32_115 : i32 to vector<8x1xi32>
    %398 = arith.cmpi eq, %396, %397 : vector<8x1xi32>
    %cst_116 = arith.constant 0.000000e+00 : f32
    %399 = vector.broadcast %cst_116 : f32 to vector<8x1xf32>
    %400 = arith.select %398, %143, %399 : vector<8x1xi1>, vector<8x1xf32>
    %401 = vector.shape_cast %400 : vector<8x1xf32> to vector<1x8x1xf32>
    %cst_117 = arith.constant dense<0.000000e+00> : vector<1xf32>
    %402 = vector.multi_reduction <add>, %401, %cst_117 [1, 2] : vector<1x8x1xf32> to vector<1xf32>
    %403 = vector.shape_cast %402 : vector<1xf32> to vector<1x1x1xf32>
    %404 = vector.extract %403[0, 0, 0] : f32 from vector<1x1x1xf32>
    %405 = tpu.iota {dimensions = array<i32: 0>} : vector<8x1xi32>
    %c5_i32_118 = arith.constant 5 : i32
    %406 = vector.broadcast %c5_i32_118 : i32 to vector<8x1xi32>
    %407 = arith.cmpi eq, %405, %406 : vector<8x1xi32>
    %cst_119 = arith.constant 0.000000e+00 : f32
    %408 = vector.broadcast %cst_119 : f32 to vector<8x1xf32>
    %409 = arith.select %407, %143, %408 : vector<8x1xi1>, vector<8x1xf32>
    %410 = vector.shape_cast %409 : vector<8x1xf32> to vector<1x8x1xf32>
    %cst_120 = arith.constant dense<0.000000e+00> : vector<1xf32>
    %411 = vector.multi_reduction <add>, %410, %cst_120 [1, 2] : vector<1x8x1xf32> to vector<1xf32>
    %412 = vector.shape_cast %411 : vector<1xf32> to vector<1x1x1xf32>
    %413 = vector.extract %412[0, 0, 0] : f32 from vector<1x1x1xf32>
    %414 = tpu.iota {dimensions = array<i32: 0>} : vector<8x1xi32>
    %c6_i32_121 = arith.constant 6 : i32
    %415 = vector.broadcast %c6_i32_121 : i32 to vector<8x1xi32>
    %416 = arith.cmpi eq, %414, %415 : vector<8x1xi32>
    %cst_122 = arith.constant 0.000000e+00 : f32
    %417 = vector.broadcast %cst_122 : f32 to vector<8x1xf32>
    %418 = arith.select %416, %143, %417 : vector<8x1xi1>, vector<8x1xf32>
    %419 = vector.shape_cast %418 : vector<8x1xf32> to vector<1x8x1xf32>
    %cst_123 = arith.constant dense<0.000000e+00> : vector<1xf32>
    %420 = vector.multi_reduction <add>, %419, %cst_123 [1, 2] : vector<1x8x1xf32> to vector<1xf32>
    %421 = vector.shape_cast %420 : vector<1xf32> to vector<1x1x1xf32>
    %422 = vector.extract %421[0, 0, 0] : f32 from vector<1x1x1xf32>
    %423 = tpu.iota {dimensions = array<i32: 0>} : vector<8x1xi32>
    %c7_i32_124 = arith.constant 7 : i32
    %424 = vector.broadcast %c7_i32_124 : i32 to vector<8x1xi32>
    %425 = arith.cmpi eq, %423, %424 : vector<8x1xi32>
    %cst_125 = arith.constant 0.000000e+00 : f32
    %426 = vector.broadcast %cst_125 : f32 to vector<8x1xf32>
    %427 = arith.select %425, %143, %426 : vector<8x1xi1>, vector<8x1xf32>
    %428 = vector.shape_cast %427 : vector<8x1xf32> to vector<1x8x1xf32>
    %cst_126 = arith.constant dense<0.000000e+00> : vector<1xf32>
    %429 = vector.multi_reduction <add>, %428, %cst_126 [1, 2] : vector<1x8x1xf32> to vector<1xf32>
    %430 = vector.shape_cast %429 : vector<1xf32> to vector<1x1x1xf32>
    %431 = vector.extract %430[0, 0, 0] : f32 from vector<1x1x1xf32>
    %cst_127 = arith.constant 0.000000e+00 : f32
    %432 = arith.cmpf ogt, %377, %cst_127 : f32
    %cst_128 = arith.constant 1.000000e+00 : f32
    %433 = arith.select %432, %377, %cst_128 : f32
    %cst_129 = arith.constant 0.000000e+00 : f32
    %434 = arith.cmpf ogt, %377, %cst_129 : f32
    %435 = arith.divf %368, %433 : f32
    %cst_130 = arith.constant 0.000000e+00 : f32
    %436 = arith.select %434, %435, %cst_130 : f32
    %cst_131 = arith.constant 0.000000e+00 : f32
    %437 = arith.cmpf ogt, %377, %cst_131 : f32
    %cst_132 = arith.constant 1.000000e+00 : f32
    %438 = arith.select %437, %377, %cst_132 : f32
    %cst_133 = arith.constant 0.000000e+00 : f32
    %439 = arith.cmpf ogt, %377, %cst_133 : f32
    %440 = arith.divf %386, %438 : f32
    %cst_134 = arith.constant 0.000000e+00 : f32
    %441 = arith.select %439, %440, %cst_134 : f32
    %cst_135 = arith.constant 0.000000e+00 : f32
    %442 = arith.cmpf ogt, %395, %cst_135 : f32
    %cst_136 = arith.constant 1.000000e+00 : f32
    %443 = arith.select %442, %395, %cst_136 : f32
    %cst_137 = arith.constant 0.000000e+00 : f32
    %444 = arith.cmpf ogt, %395, %cst_137 : f32
    %445 = arith.divf %404, %443 : f32
    %cst_138 = arith.constant 0.000000e+00 : f32
    %446 = arith.select %444, %445, %cst_138 : f32
    %447 = arith.subf %386, %404 : f32
    %448 = arith.subf %377, %395 : f32
    %cst_139 = arith.constant 0.000000e+00 : f32
    %449 = arith.cmpf ogt, %448, %cst_139 : f32
    %cst_140 = arith.constant 1.000000e+00 : f32
    %450 = arith.select %449, %448, %cst_140 : f32
    %cst_141 = arith.constant 0.000000e+00 : f32
    %451 = arith.cmpf ogt, %448, %cst_141 : f32
    %452 = arith.divf %447, %450 : f32
    %cst_142 = arith.constant 0.000000e+00 : f32
    %453 = arith.select %451, %452, %cst_142 : f32
    %cst_143 = arith.constant 0.000000e+00 : f32
    %454 = arith.cmpf ogt, %422, %cst_143 : f32
    %cst_144 = arith.constant 1.000000e+00 : f32
    %455 = arith.select %454, %422, %cst_144 : f32
    %cst_145 = arith.constant 0.000000e+00 : f32
    %456 = arith.cmpf ogt, %422, %cst_145 : f32
    %457 = arith.divf %413, %455 : f32
    %cst_146 = arith.constant 0.000000e+00 : f32
    %458 = arith.select %456, %457, %cst_146 : f32
    %cst_147 = arith.constant 2.000000e+00 : f32
    %459 = arith.mulf %cst_147, %422 : f32
    %cst_148 = arith.constant 0.000000e+00 : f32
    %460 = arith.cmpf ogt, %459, %cst_148 : f32
    %cst_149 = arith.constant 1.000000e+00 : f32
    %461 = arith.select %460, %459, %cst_149 : f32
    %cst_150 = arith.constant 0.000000e+00 : f32
    %462 = arith.cmpf ogt, %459, %cst_150 : f32
    %463 = arith.divf %431, %461 : f32
    %cst_151 = arith.constant 0.000000e+00 : f32
    %464 = arith.select %462, %463, %cst_151 : f32
    %465 = tpu.iota {dimensions = array<i32: 0>} : vector<11x1xi32>
    %c1_i32_152 = arith.constant 1 : i32
    %466 = vector.broadcast %c1_i32_152 : i32 to vector<11x1xi32>
    %467 = arith.cmpi eq, %465, %466 : vector<11x1xi32>
    %cst_153 = arith.constant 0.000000e+00 : f32
    %468 = vector.broadcast %cst_153 : f32 to vector<11x1xf32>
    %469 = arith.select %467, %359, %468 : vector<11x1xi1>, vector<11x1xf32>
    %470 = vector.shape_cast %469 : vector<11x1xf32> to vector<1x11x1xf32>
    %cst_154 = arith.constant dense<0.000000e+00> : vector<1xf32>
    %471 = vector.multi_reduction <add>, %470, %cst_154 [1, 2] : vector<1x11x1xf32> to vector<1xf32>
    %472 = vector.shape_cast %471 : vector<1xf32> to vector<1x1x1xf32>
    %473 = vector.extract %472[0, 0, 0] : f32 from vector<1x1x1xf32>
    %474 = tpu.iota {dimensions = array<i32: 0>} : vector<11x1xi32>
    %c0_i32_155 = arith.constant 0 : i32
    %475 = vector.broadcast %c0_i32_155 : i32 to vector<11x1xi32>
    %476 = arith.cmpi eq, %474, %475 : vector<11x1xi32>
    %cst_156 = arith.constant 0.000000e+00 : f32
    %477 = vector.broadcast %cst_156 : f32 to vector<11x1xf32>
    %478 = arith.select %476, %359, %477 : vector<11x1xi1>, vector<11x1xf32>
    %479 = vector.shape_cast %478 : vector<11x1xf32> to vector<1x11x1xf32>
    %cst_157 = arith.constant dense<0.000000e+00> : vector<1xf32>
    %480 = vector.multi_reduction <add>, %479, %cst_157 [1, 2] : vector<1x11x1xf32> to vector<1xf32>
    %481 = vector.shape_cast %480 : vector<1xf32> to vector<1x1x1xf32>
    %482 = vector.extract %481[0, 0, 0] : f32 from vector<1x1x1xf32>
    %cst_158 = arith.constant 0.000000e+00 : f32
    %483 = arith.cmpf ogt, %473, %cst_158 : f32
    %cst_159 = arith.constant 1.000000e+00 : f32
    %484 = arith.select %483, %473, %cst_159 : f32
    %cst_160 = arith.constant 0.000000e+00 : f32
    %485 = arith.cmpf ogt, %473, %cst_160 : f32
    %486 = arith.divf %482, %484 : f32
    %cst_161 = arith.constant 0.000000e+00 : f32
    %487 = arith.select %485, %486, %cst_161 : f32
    %488 = tpu.iota {dimensions = array<i32: 0>} : vector<11x1xi32>
    %c2_i32_162 = arith.constant 2 : i32
    %489 = vector.broadcast %c2_i32_162 : i32 to vector<11x1xi32>
    %490 = arith.cmpi eq, %488, %489 : vector<11x1xi32>
    %cst_163 = arith.constant 0.000000e+00 : f32
    %491 = vector.broadcast %cst_163 : f32 to vector<11x1xf32>
    %492 = arith.select %490, %359, %491 : vector<11x1xi1>, vector<11x1xf32>
    %493 = vector.shape_cast %492 : vector<11x1xf32> to vector<1x11x1xf32>
    %cst_164 = arith.constant dense<0.000000e+00> : vector<1xf32>
    %494 = vector.multi_reduction <add>, %493, %cst_164 [1, 2] : vector<1x11x1xf32> to vector<1xf32>
    %495 = vector.shape_cast %494 : vector<1xf32> to vector<1x1x1xf32>
    %496 = vector.extract %495[0, 0, 0] : f32 from vector<1x1x1xf32>
    %cst_165 = arith.constant 0.000000e+00 : f32
    %497 = arith.cmpf ogt, %473, %cst_165 : f32
    %cst_166 = arith.constant 1.000000e+00 : f32
    %498 = arith.select %497, %473, %cst_166 : f32
    %cst_167 = arith.constant 0.000000e+00 : f32
    %499 = arith.cmpf ogt, %473, %cst_167 : f32
    %500 = arith.divf %496, %498 : f32
    %cst_168 = arith.constant 0.000000e+00 : f32
    %501 = arith.select %499, %500, %cst_168 : f32
    %502 = tpu.iota {dimensions = array<i32: 0>} : vector<11x1xi32>
    %c3_i32_169 = arith.constant 3 : i32
    %503 = vector.broadcast %c3_i32_169 : i32 to vector<11x1xi32>
    %504 = arith.cmpi eq, %502, %503 : vector<11x1xi32>
    %cst_170 = arith.constant 0.000000e+00 : f32
    %505 = vector.broadcast %cst_170 : f32 to vector<11x1xf32>
    %506 = arith.select %504, %359, %505 : vector<11x1xi1>, vector<11x1xf32>
    %507 = vector.shape_cast %506 : vector<11x1xf32> to vector<1x11x1xf32>
    %cst_171 = arith.constant dense<0.000000e+00> : vector<1xf32>
    %508 = vector.multi_reduction <add>, %507, %cst_171 [1, 2] : vector<1x11x1xf32> to vector<1xf32>
    %509 = vector.shape_cast %508 : vector<1xf32> to vector<1x1x1xf32>
    %510 = vector.extract %509[0, 0, 0] : f32 from vector<1x1x1xf32>
    %511 = tpu.iota {dimensions = array<i32: 0>} : vector<11x1xi32>
    %c4_i32_172 = arith.constant 4 : i32
    %512 = vector.broadcast %c4_i32_172 : i32 to vector<11x1xi32>
    %513 = arith.cmpi eq, %511, %512 : vector<11x1xi32>
    %cst_173 = arith.constant 0.000000e+00 : f32
    %514 = vector.broadcast %cst_173 : f32 to vector<11x1xf32>
    %515 = arith.select %513, %359, %514 : vector<11x1xi1>, vector<11x1xf32>
    %516 = vector.shape_cast %515 : vector<11x1xf32> to vector<1x11x1xf32>
    %cst_174 = arith.constant dense<0.000000e+00> : vector<1xf32>
    %517 = vector.multi_reduction <add>, %516, %cst_174 [1, 2] : vector<1x11x1xf32> to vector<1xf32>
    %518 = vector.shape_cast %517 : vector<1xf32> to vector<1x1x1xf32>
    %519 = vector.extract %518[0, 0, 0] : f32 from vector<1x1x1xf32>
    %cst_175 = arith.constant 0.000000e+00 : f32
    %520 = arith.cmpf ogt, %519, %cst_175 : f32
    %cst_176 = arith.constant 1.000000e+00 : f32
    %521 = arith.select %520, %519, %cst_176 : f32
    %cst_177 = arith.constant 0.000000e+00 : f32
    %522 = arith.cmpf ogt, %519, %cst_177 : f32
    %523 = arith.divf %510, %521 : f32
    %cst_178 = arith.constant 0.000000e+00 : f32
    %524 = arith.select %522, %523, %cst_178 : f32
    %525 = tpu.iota {dimensions = array<i32: 0>} : vector<11x1xi32>
    %c5_i32_179 = arith.constant 5 : i32
    %526 = vector.broadcast %c5_i32_179 : i32 to vector<11x1xi32>
    %527 = arith.cmpi eq, %525, %526 : vector<11x1xi32>
    %cst_180 = arith.constant 0.000000e+00 : f32
    %528 = vector.broadcast %cst_180 : f32 to vector<11x1xf32>
    %529 = arith.select %527, %359, %528 : vector<11x1xi1>, vector<11x1xf32>
    %530 = vector.shape_cast %529 : vector<11x1xf32> to vector<1x11x1xf32>
    %cst_181 = arith.constant dense<0.000000e+00> : vector<1xf32>
    %531 = vector.multi_reduction <add>, %530, %cst_181 [1, 2] : vector<1x11x1xf32> to vector<1xf32>
    %532 = vector.shape_cast %531 : vector<1xf32> to vector<1x1x1xf32>
    %533 = vector.extract %532[0, 0, 0] : f32 from vector<1x1x1xf32>
    %534 = tpu.iota {dimensions = array<i32: 0>} : vector<11x1xi32>
    %c6_i32_182 = arith.constant 6 : i32
    %535 = vector.broadcast %c6_i32_182 : i32 to vector<11x1xi32>
    %536 = arith.cmpi eq, %534, %535 : vector<11x1xi32>
    %cst_183 = arith.constant 0.000000e+00 : f32
    %537 = vector.broadcast %cst_183 : f32 to vector<11x1xf32>
    %538 = arith.select %536, %359, %537 : vector<11x1xi1>, vector<11x1xf32>
    %539 = vector.shape_cast %538 : vector<11x1xf32> to vector<1x11x1xf32>
    %cst_184 = arith.constant dense<0.000000e+00> : vector<1xf32>
    %540 = vector.multi_reduction <add>, %539, %cst_184 [1, 2] : vector<1x11x1xf32> to vector<1xf32>
    %541 = vector.shape_cast %540 : vector<1xf32> to vector<1x1x1xf32>
    %542 = vector.extract %541[0, 0, 0] : f32 from vector<1x1x1xf32>
    %cst_185 = arith.constant 0.000000e+00 : f32
    %543 = arith.cmpf ogt, %542, %cst_185 : f32
    %cst_186 = arith.constant 1.000000e+00 : f32
    %544 = arith.select %543, %542, %cst_186 : f32
    %cst_187 = arith.constant 0.000000e+00 : f32
    %545 = arith.cmpf ogt, %542, %cst_187 : f32
    %546 = arith.divf %533, %544 : f32
    %cst_188 = arith.constant 0.000000e+00 : f32
    %547 = arith.select %545, %546, %cst_188 : f32
    %548 = tpu.iota {dimensions = array<i32: 0>} : vector<11x1xi32>
    %c7_i32_189 = arith.constant 7 : i32
    %549 = vector.broadcast %c7_i32_189 : i32 to vector<11x1xi32>
    %550 = arith.cmpi eq, %548, %549 : vector<11x1xi32>
    %cst_190 = arith.constant 0.000000e+00 : f32
    %551 = vector.broadcast %cst_190 : f32 to vector<11x1xf32>
    %552 = arith.select %550, %359, %551 : vector<11x1xi1>, vector<11x1xf32>
    %553 = vector.shape_cast %552 : vector<11x1xf32> to vector<1x11x1xf32>
    %cst_191 = arith.constant dense<0.000000e+00> : vector<1xf32>
    %554 = vector.multi_reduction <add>, %553, %cst_191 [1, 2] : vector<1x11x1xf32> to vector<1xf32>
    %555 = vector.shape_cast %554 : vector<1xf32> to vector<1x1x1xf32>
    %556 = vector.extract %555[0, 0, 0] : f32 from vector<1x1x1xf32>
    %557 = tpu.iota {dimensions = array<i32: 0>} : vector<11x1xi32>
    %c8_i32_192 = arith.constant 8 : i32
    %558 = vector.broadcast %c8_i32_192 : i32 to vector<11x1xi32>
    %559 = arith.cmpi eq, %557, %558 : vector<11x1xi32>
    %cst_193 = arith.constant 0.000000e+00 : f32
    %560 = vector.broadcast %cst_193 : f32 to vector<11x1xf32>
    %561 = arith.select %559, %359, %560 : vector<11x1xi1>, vector<11x1xf32>
    %562 = vector.shape_cast %561 : vector<11x1xf32> to vector<1x11x1xf32>
    %cst_194 = arith.constant dense<0.000000e+00> : vector<1xf32>
    %563 = vector.multi_reduction <add>, %562, %cst_194 [1, 2] : vector<1x11x1xf32> to vector<1xf32>
    %564 = vector.shape_cast %563 : vector<1xf32> to vector<1x1x1xf32>
    %565 = vector.extract %564[0, 0, 0] : f32 from vector<1x1x1xf32>
    %cst_195 = arith.constant 1.000000e+00 : f32
    %566 = arith.addf %556, %cst_195 : f32
    %cst_196 = arith.constant 1.000000e+00 : f32
    %567 = arith.addf %565, %cst_196 : f32
    %568 = arith.divf %566, %567 : f32
    %cst_197 = arith.constant 1.000000e+00 : f32
    %569 = arith.subf %cst_197, %568 : f32
    %cst_198 = arith.constant 0.000000e+00 : f32
    %570 = arith.addf %cst_198, %569 : f32
    %571 = tpu.iota {dimensions = array<i32: 0>} : vector<11x1xi32>
    %c9_i32_199 = arith.constant 9 : i32
    %572 = vector.broadcast %c9_i32_199 : i32 to vector<11x1xi32>
    %573 = arith.cmpi eq, %571, %572 : vector<11x1xi32>
    %cst_200 = arith.constant 0.000000e+00 : f32
    %574 = vector.broadcast %cst_200 : f32 to vector<11x1xf32>
    %575 = arith.select %573, %359, %574 : vector<11x1xi1>, vector<11x1xf32>
    %576 = vector.shape_cast %575 : vector<11x1xf32> to vector<1x11x1xf32>
    %cst_201 = arith.constant dense<0.000000e+00> : vector<1xf32>
    %577 = vector.multi_reduction <add>, %576, %cst_201 [1, 2] : vector<1x11x1xf32> to vector<1xf32>
    %578 = vector.shape_cast %577 : vector<1xf32> to vector<1x1x1xf32>
    %579 = vector.extract %578[0, 0, 0] : f32 from vector<1x1x1xf32>
    %580 = tpu.iota {dimensions = array<i32: 0>} : vector<11x1xi32>
    %c10_i32_202 = arith.constant 10 : i32
    %581 = vector.broadcast %c10_i32_202 : i32 to vector<11x1xi32>
    %582 = arith.cmpi eq, %580, %581 : vector<11x1xi32>
    %cst_203 = arith.constant 0.000000e+00 : f32
    %583 = vector.broadcast %cst_203 : f32 to vector<11x1xf32>
    %584 = arith.select %582, %359, %583 : vector<11x1xi1>, vector<11x1xf32>
    %585 = vector.shape_cast %584 : vector<11x1xf32> to vector<1x11x1xf32>
    %cst_204 = arith.constant dense<0.000000e+00> : vector<1xf32>
    %586 = vector.multi_reduction <add>, %585, %cst_204 [1, 2] : vector<1x11x1xf32> to vector<1xf32>
    %587 = vector.shape_cast %586 : vector<1xf32> to vector<1x1x1xf32>
    %588 = vector.extract %587[0, 0, 0] : f32 from vector<1x1x1xf32>
    %cst_205 = arith.constant 1.000000e+00 : f32
    %589 = arith.addf %579, %cst_205 : f32
    %cst_206 = arith.constant 1.000000e+00 : f32
    %590 = arith.addf %588, %cst_206 : f32
    %591 = arith.divf %589, %590 : f32
    %cst_207 = arith.constant 1.000000e+00 : f32
    %592 = arith.subf %cst_207, %591 : f32
    %593 = arith.addf %570, %592 : f32
    %cst_208 = arith.constant 2.000000e+00 : f32
    %594 = arith.divf %593, %cst_208 : f32
    %cst_209 = arith.constant 1.000000e+00 : f32
    %595 = arith.mulf %cst_209, %436 : f32
    %cst_210 = arith.constant 1.000000e+00 : f32
    %596 = arith.mulf %cst_210, %487 : f32
    %597 = arith.addf %595, %596 : f32
    %cst_211 = arith.constant 1.000000e+00 : f32
    %598 = arith.mulf %cst_211, %594 : f32
    %599 = arith.addf %597, %598 : f32
    %cst_212 = arith.constant 1.000000e+00 : f32
    %600 = arith.mulf %cst_212, %458 : f32
    %601 = arith.addf %599, %600 : f32
    %cst_213 = arith.constant 1.000000e+00 : f32
    %602 = arith.mulf %cst_213, %464 : f32
    %603 = arith.addf %601, %602 : f32
    %cst_214 = arith.constant 1.000000e+00 : f32
    %604 = arith.mulf %cst_214, %524 : f32
    %605 = arith.addf %603, %604 : f32
    %c0_215 = arith.constant 0 : index
    %606 = memref.load %arg2[%c0_215] : memref<12xf32, #tpu.memory_space<smem>>
    memref.store %436, %arg2[%c0_215] : memref<12xf32, #tpu.memory_space<smem>>
    %c1_216 = arith.constant 1 : index
    %607 = memref.load %arg2[%c1_216] : memref<12xf32, #tpu.memory_space<smem>>
    memref.store %441, %arg2[%c1_216] : memref<12xf32, #tpu.memory_space<smem>>
    %c2_217 = arith.constant 2 : index
    %608 = memref.load %arg2[%c2_217] : memref<12xf32, #tpu.memory_space<smem>>
    memref.store %446, %arg2[%c2_217] : memref<12xf32, #tpu.memory_space<smem>>
    %c3_218 = arith.constant 3 : index
    %609 = memref.load %arg2[%c3_218] : memref<12xf32, #tpu.memory_space<smem>>
    memref.store %453, %arg2[%c3_218] : memref<12xf32, #tpu.memory_space<smem>>
    %c4_219 = arith.constant 4 : index
    %610 = memref.load %arg2[%c4_219] : memref<12xf32, #tpu.memory_space<smem>>
    memref.store %487, %arg2[%c4_219] : memref<12xf32, #tpu.memory_space<smem>>
    %c5_220 = arith.constant 5 : index
    %611 = memref.load %arg2[%c5_220] : memref<12xf32, #tpu.memory_space<smem>>
    memref.store %501, %arg2[%c5_220] : memref<12xf32, #tpu.memory_space<smem>>
    %c6_221 = arith.constant 6 : index
    %612 = memref.load %arg2[%c6_221] : memref<12xf32, #tpu.memory_space<smem>>
    memref.store %594, %arg2[%c6_221] : memref<12xf32, #tpu.memory_space<smem>>
    %c7_222 = arith.constant 7 : index
    %613 = memref.load %arg2[%c7_222] : memref<12xf32, #tpu.memory_space<smem>>
    memref.store %458, %arg2[%c7_222] : memref<12xf32, #tpu.memory_space<smem>>
    %c8_223 = arith.constant 8 : index
    %614 = memref.load %arg2[%c8_223] : memref<12xf32, #tpu.memory_space<smem>>
    memref.store %464, %arg2[%c8_223] : memref<12xf32, #tpu.memory_space<smem>>
    %c9_224 = arith.constant 9 : index
    %615 = memref.load %arg2[%c9_224] : memref<12xf32, #tpu.memory_space<smem>>
    memref.store %524, %arg2[%c9_224] : memref<12xf32, #tpu.memory_space<smem>>
    %c10_225 = arith.constant 10 : index
    %616 = memref.load %arg2[%c10_225] : memref<12xf32, #tpu.memory_space<smem>>
    memref.store %547, %arg2[%c10_225] : memref<12xf32, #tpu.memory_space<smem>>
    %c11 = arith.constant 11 : index
    %617 = memref.load %arg2[%c11] : memref<12xf32, #tpu.memory_space<smem>>
    memref.store %605, %arg2[%c11] : memref<12xf32, #tpu.memory_space<smem>>
    return
  }
}

</mosaic_0001>

<bundles_post_ra>
// kernel: criterion_forward.1
= control target key start
LH: loop header
LB: loop body
LE: loop exit
PB: predicated region body
PF: predicated region fallthrough
CT: control target
= control target key end

     0   :  { %s2421_s0 = inlined_call_operand.vmem [shape: f32[16,128], index: 0, kind: input, shape index: {}]   ;;  %s2422_s1 = inlined_call_operand.vmem [shape: f32[48,512], index: 1, kind: input, shape index: {}]   ;;  %s2423_s2 = inlined_call_operand.hbm [shape: f32[12], index: 2, kind: output, shape index: {}]  }
   0x1   :  { %v1610_v0 = vld [vmem:[%s2421_s0] sm:$0x1]  ;;  %v28_v1 = vld [vmem:[%s2421_s0 + $0x7] sm:$0x1]  ;;  %v30_v2 = vld [vmem:[%s2421_s0 + $0x9] sm:$0x1] }
   0x2   :  { %v1621_v3 = vld [vmem:[%s2421_s0 + $0xa] sm:$0x1]  ;;  %v83_v4 = vand.u32 2147483647, %v1610_v0 }
   0x3   :  { %7 = vsyncpa [#allocation3], 0  ;;  %vm34_vm0 = vcmp.gt.f32.partialorder %v1621_v3, 0.0  ;;  %vm18_vm1 = vcmp.gt.f32.partialorder %v1610_v0, 0.0  ;;  %v24_v12 = vld [vmem:[%s2421_s0 + $0x3] sm:$0x1]  ;;  %v107_v44 = vlaneseq }
   0x4   :  { %v35_v5 = vsel %vm34_vm0, %v28_v1, 1.0  ;;  %v1625_v6 = vsel %vm34_vm0, %v30_v2, 1.0  ;;  %v84_v7 = vsub.f32 0.0, %v83_v4  ;;  %v26_v15 = vld [vmem:[%s2421_s0 + $0x5] sm:$0x1]  ;;  %v1587_v19 = vmov 0.0  }
   0x5   :  { %1503 = vrcp.f32 %v35_v5  ;;  %v48_v13 = vand.u32 2147483648, %v35_v5  ;;  %vm42_vm2 = vweird.f32 %v35_v5  ;;  %v46_v17 = vand.u32 2147483647, %v35_v5  ;;  %v1641_v25 = vld [vmem:[%s2421_s0 + $0x1] sm:$0x1] }
   0x6   :  { %1505 = vrcp.f32 %v1625_v6  ;;  %v85_v8 = vmul.f32 1.442695, %v84_v7  ;;  %v1430_v20 = vsel %vm18_vm1, 1.0, %v1587_v19  ;;  %vm59_vm4 = vweird.f32 %v1625_v6  ;;  %v25_v33 = vld [vmem:[%s2421_s0 + $0x4] sm:$0x1] }
   0x7   :  { %v1643_v26 = vsub.f32 %v24_v12, %v26_v15  ;;  %v49_v28 = vor.u32 1.1754944e-38, %v48_v13  ;;  %v65_v30 = vand.u32 2147483648, %v1625_v6  ;;  %vm47_vm7 = vcmp.eq.f32.partialorder %v46_v17, 8.507059e+37  ;;  %v27_v34 = vld [vmem:[%s2421_s0 + $0x6] sm:$0x1] }
   0x8   :  { %1507 = vpow2.f32 %v85_v8  ;;  %v63_v32 = vand.u32 2147483647, %v1625_v6  ;;  %vm15_vm8 = vcmp.gt.f32.partialorder %v1641_v25, 0.5  ;;  %v95_v39 = vmax.f32 %v1610_v0, 0.0  ;;  %v29_v41 = vld [vmem:[%s2421_s0 + $0x8] sm:$0x1] }
   0x9   :  { %v96_v40 = vmul.f32 %v1641_v25, %v1610_v0  ;;  %vm21_vm10 = vcmp.eq.f32.partialorder %v1430_v20, %v1641_v25  ;;  %v66_v43 = vor.u32 1.1754944e-38, %v65_v30  ;;  %v33_v45 = vsub.f32 %v25_v33, %v27_v34  ;;  %v14_v48 = vld [vmem:[%s2421_s0 + $0x2] sm:$0x1] }
   0xa   :  { %vm64_vm11 = vcmp.eq.f32.partialorder %v63_v32, 8.507059e+37  ;;  %v1588_v49 = vmov 0.1   ;;  %v22_v53 = vsel %vm21_vm10, 1.0, %v1587_v19  ;;  %v1684_v58 = vshrl.u32 %v107_v44, 7 }
   0xb   :  { %v1504_v9 = vpop.eup %1503  ;;  %v16_v50 = vsel %vm15_vm8, 1.0, %v1588_v49  ;;  %v97_v55 = vsub.f32 %v95_v39, %v96_v40  ;;  %v23_v61 = vmul.f32 %v22_v53, %v14_v48  ;;  %v1501_v2 = vld [vmem:[%s2421_s0 + $0x2] ss:$0 sm:$0xff]  ;;  %v100_v8 = vmul.f32 %v14_v48, %v1641_v25 }
   0xc   :  { %v1506_v10 = vpop.eup %1505  ;;  %v38_v11 = vmul.f32 %v1504_v9, %v35_v5  ;;  %vm43_vm3 = vweird.f32 %v1504_v9  ;;  %v17_v59 = vmul.f32 %v16_v50, %v14_v48  ;;  %vm113_vm13 = vcmp.eq.s32.totalorder %v1684_v58, 1  ;;  %v1746_v50 = vld [vmem:[%s2422_s1 + $0x70] sm:$0xff] }
   0xd   :  { %v55_v14 = vmul.f32 %v1506_v10, %v1625_v6  ;;  %vm60_vm5 = vweird.f32 %v1506_v10  ;;  %vm1645_vm6 = vmor %vm42_vm2, %vm43_vm3  ;;  %vm109_vm14 = vcmp.eq.s32.totalorder %v1684_v58, 0  ;;  %v115_v13 = vsel %vm113_vm13, %v1501_v2, 0.0 }
   0xe   :  { %v39_v16 = vsub.f32 1.0, %v38_v11  ;;  %v1508_v18 = vpop.eup %1507  ;;  %vm1661_vm9 = vmor %vm59_vm4, %vm60_vm5  ;;  %vm117_vm15 = vcmp.eq.s32.totalorder %v1684_v58, 2  ;;  %v101_v17 = vmul.f32 %v23_v61, %v1641_v25  ;;  %vm121_vm0 = vcmp.eq.s32.totalorder %v1684_v58, 3 }
   0xf   :  { %v56_v21 = vsub.f32 1.0, %v55_v14  ;;  %v88_v23 = vmul.f32 0.5, %v1508_v18  ;;  %v91_v24 = vadd.f32 1.0, %v1508_v18  ;;  %vm87_vm12 = vcmp.lt.f32.partialorder %v1508_v18, 0.0001 }
  0x10   :  { %v40_v22 = vmul.f32 %v1504_v9, %v39_v16  ;;  %v126_v25 = vperm.slane %v101_v17, 0  ;;  %vm125_vm1 = vcmp.eq.s32.totalorder %v1684_v58, 4  ;;  %vm129_vm3 = vcmp.eq.s32.totalorder %v1684_v58, 5 }
  0x11   :  { %v57_v29 = vmul.f32 %v1506_v10, %v56_v21  ;;  %1509 = vlog2.f32 %v91_v24  ;;  %v89_v37 = vsub.f32 1.0, %v88_v23  ;;  %v122_v24 = vperm.slane %v100_v8, 0  ;;  %v151_v8 = vld [vmem:[%s2422_s1 + $0x40] sm:$0xff] }
  0x12   :  { %v41_v31 = vadd.f32 %v1504_v9, %v40_v22  ;;  %1511 = vlog2.f32 %v35_v5  ;;  %v104_v22 = vmul.f32 %v33_v45, %v33_v45  ;;  %v127_v34 = vsel %vm125_vm1, %v126_v25, 0.0 }
  0x13   :  { %v58_v35 = vadd.f32 %v1506_v10, %v57_v29  ;;  %v90_v51 = vmul.f32 %v1508_v18, %v89_v37  ;;  %1513 = vlog2.f32 %v1625_v6  ;;  %v103_v18 = vmul.f32 %v1643_v26, %v1643_v26  ;;  %v1502_v37 = vld [vmem:[%s2421_s0 + $0xa] ss:$0 sm:$0xff] }
  0x14   :  { %v45_v38 = vsel %vm1645_vm6, %v1504_v9, %v41_v31  ;;  %v118_v9 = vperm.slane %v23_v61, 0  ;;  %v123_v31 = vsel %vm121_vm0, %v122_v24, 0.0  ;;  %vm133_vm4 = vcmp.eq.s32.totalorder %v1684_v58, 6 }
  0x15   :  { %v50_v42 = vsel %vm47_vm7, %v49_v28, %v45_v38  ;;  %v62_v47 = vsel %vm1661_vm9, %v1506_v10, %v58_v35  ;;  %v105_v30 = vadd.f32 %v104_v22, %v103_v18  ;;  %vm137_vm5 = vcmp.eq.s32.totalorder %v1684_v58, 7  ;;  %v150_v22 = vld [vmem:[%s2422_s1 + $0x38] sm:$0xff] }
  0x16   :  { %v51_v46 = vmul.f32 %v50_v42, %v1643_v26  ;;  %v67_v56 = vsel %vm64_vm11, %v66_v43, %v62_v47  ;;  %v119_v23 = vsel %vm117_vm15, %v118_v9, 0.0  ;;  %v135_v42 = vsel %vm133_vm4, %v1502_v37, 0.0  ;;  %v1730_v47 = vld [vmem:[%s2422_s1 + $0x68] sm:$0xff] }
  0x17   :  { %v1510_v52 = vpop.eup %1509  ;;  %v106_v33 = vmul.f32 %v105_v30, %v1621_v3  ;;  %vm169_vm6 = vcmp.lt.s32.totalorder %v1684_v58, 4  ;;  %v152_v9 = vld [vmem:[%s2422_s1 + $0x48] sm:$0xff]  ;;  %vm175_vm7 = vcmp.gt.f32.partialorder %v151_v8, 0.0 }
  0x18   :  { %v52_v54 = vmul.f32 %v51_v46, %v29_v41  ;;  %v93_v57 = vmul.f32 0.6931472, %v1510_v52  ;;  %v69_v0 = vmul.f32 %v51_v46, %v51_v46  ;;  %v1512_v4 = vpop.eup %1511  ;;  %v1725_v46 = vld [vmem:[%s2422_s1 + $0x60] sm:$0xff]  ;;  %v1741_v49 = vsel %vm169_vm6, %v1730_v47, -1e+30 }
  0x19   :  { %v1514_v6 = vpop.eup %1513  ;;  %v74_v11 = vmul.f32 0.6931472, %v1512_v4  ;;  %v138_v40 = vperm.slane %v106_v33, 0  ;;  %v1736_v48 = vsel %vm169_vm6, %v1725_v46, -1e+30  ;;  %v217_v52 = vrot.slane %v1741_v49, 4 }
  0x1a   :  { %v53_v60 = vsub.f32 %v33_v45, %v52_v54  ;;  %v94_v62 = vsel %vm87_vm12, %v90_v51, %v93_v57  ;;  %v77_v15 = vmul.f32 0.6931472, %v1514_v6  ;;  %v211_v51 = vrot.slane %v1736_v48, 4  ;;  %v1758_v54 = vld [vmem:[%s2422_s1 + $0x78] sm:$0xff] }
  0x1b   :  { %v98_v1 = vadd.f32 %v97_v55, %v94_v62  ;;  %v139_v43 = vsel %vm137_vm5, %v138_v40, 0.0  ;;  %v1753_v53 = vsel %vm169_vm6, %v1746_v50, -1e+30  ;;  %vm176_vm8 = vcmp.gt.f32.partialorder %v152_v9, 0.0 }
  0x1c   :  { %v68_v63 = vmul.f32 %v67_v56, %v53_v60  ;;  %v212_v55 = vmax.f32 %v1736_v48, %v211_v51  ;;  %v218_v56 = vmax.f32 %v1741_v49, %v217_v52  ;;  %v223_v57 = vrot.slane %v1753_v53, 4 }
  0x1d   :  { %v99_v7 = vmul.f32 %v98_v1, %v17_v59  ;;  %v1766_v59 = vsel %vm169_vm6, %v1758_v54, -1e+30 }
  0x1e   :  { %v70_v5 = vmul.f32 %v68_v63, %v68_v63  ;;  %v213_v60 = vrot.slane %v212_v55, 2  ;;  %v219_v61 = vrot.slane %v218_v56, 2  ;;  %v224_v62 = vmax.f32 %v1753_v53, %v223_v57 }
  0x1f   :  { %v110_v12 = vperm.slane %v99_v7, 0  ;;  %v229_v63 = vrot.slane %v1766_v59, 4 }
  0x20   :  { %v71_v10 = vadd.f32 %v70_v5, %v69_v0  ;;  %v214_v0 = vmax.f32 %v212_v55, %v213_v60  ;;  %v220_v1 = vmax.f32 %v218_v56, %v219_v61  ;;  %v225_v2 = vrot.slane %v224_v62, 2 }
  0x21   :  { %v111_v16 = vsel %vm109_vm14, %v110_v12, 0.0  ;;  %v230_v4 = vmax.f32 %v1766_v59, %v229_v63  ;;  %v147_v12 = vld [vmem:[%s2422_s1 + $0x20] sm:$0xff] }
  0x22   :  { %v72_v14 = vmul.f32 0.5, %v71_v10  ;;  %v116_v20 = vadd.f32 %v115_v13, %v111_v16  ;;  %v215_v5 = vrot.slane %v214_v0, 1  ;;  %v221_v7 = vrot.slane %v220_v1, 1  ;;  %v153_v10 = vld [vmem:[%s2422_s1 + $0x50] sm:$0xff]  ;;  %v148_v13 = vld [vmem:[%s2422_s1 + $0x28] sm:$0xff]  ;;  %v154_v16 = vld [vmem:[%s2422_s1 + $0x58] sm:$0xff] }
  0x23   :  { %v226_v6 = vmax.f32 %v224_v62, %v225_v2  ;;  %vm177_vm9 = vcmp.gt.f32.partialorder %v153_v10, 0.0  ;;  %v1794_v17 = vsel %vm175_vm7, %v147_v12, -1e+30  ;;  %v1796_v18 = vsel %vm176_vm8, %v148_v13, -1e+30 }
  0x24   :  { %v75_v21 = vadd.f32 %v74_v11, %v72_v14  ;;  %v120_v28 = vadd.f32 %v119_v23, %v116_v20  ;;  %v231_v11 = vrot.slane %v230_v4, 2  ;;  %v149_v14 = vld [vmem:[%s2422_s1 + $0x30] sm:$0xff]  ;;  %v1798_v20 = vmax.f32 %v220_v1, %v221_v7 }
  0x25   :  { %vm178_vm10 = vcmp.gt.f32.partialorder %v154_v16, 0.0  ;;  %v1803_v23 = vsel %vm177_vm9, %v149_v14, -1e+30  ;;  %v187_v24 = vrot.slane %v1794_v17, 4 }
  0x26   :  { %v78_v27 = vadd.f32 %v77_v15, %v75_v21  ;;  %v124_v32 = vadd.f32 %v123_v31, %v120_v28  ;;  %v1789_v15 = vmax.f32 %v214_v0, %v215_v5  ;;  %v227_v21 = vrot.slane %v226_v6, 1 }
  0x27   :  { %v1807_v28 = vsel %vm178_vm10, %v150_v22, -1e+30  ;;  %v232_v31 = vmax.f32 %v230_v4, %v231_v11  ;;  %v188_v25 = vmax.f32 %v1794_v17, %v187_v24 }
  0x28   :  { %v79_v29 = vadd.f32 1.837877, %v78_v27  ;;  %v128_v38 = vadd.f32 %v127_v34, %v124_v32  ;;  %v193_v27 = vrot.slane %v1796_v18, 4  ;;  %v1810_v30 = vmax.f32 %v226_v6, %v227_v21 }
  0x29   :  { %v205_v32 = vrot.slane %v1807_v28, 4  ;;  %v247_v33 = vperm.slane %v1789_v15, 0 }
  0x2a   :  { %v80_v26 = vand.u32 2147483647, %v79_v29  ;;  %v249_v37 = vperm.slane %v1810_v30, 0 }
  0x2b   :  { %v206_v40 = vmax.f32 %v1807_v28, %v205_v32 }
  0x2c   :  { %vm81_vm2 = vcmp.eq.f32.partialorder %v80_v26, inf  ;;  %v194_v26 = vmax.f32 %v1796_v18, %v193_v27 }
  0x2d   :  { %v82_v35 = vsel %vm81_vm2, 10000000.0, %v79_v29  ;;  %v199_v29 = vrot.slane %v1803_v23, 4  ;;  %v207_v52 = vrot.slane %v206_v40, 2 }
  0x2e   :  { %v102_v36 = vmul.f32 %v82_v35, %v1621_v3  ;;  %v233_v35 = vrot.slane %v232_v31, 1 }
  0x2f   :  { %v200_v34 = vmax.f32 %v1803_v23, %v199_v29  ;;  %v208_v0 = vmax.f32 %v206_v40, %v207_v52 }
  0x30   :  { %v130_v39 = vperm.slane %v102_v36, 0  ;;  %v248_v36 = vperm.slane %v1798_v20, 0 }
  0x31   :  { %v209_v7 = vrot.slane %v208_v0, 1 }
  0x32   :  { %v131_v41 = vsel %vm129_vm3, %v130_v39, 0.0  ;;  %v195_v39 = vrot.slane %v194_v26, 2 }
  0x33   :  { %v132_v3 = vadd.f32 %v131_v41, %v128_v38  ;;  %v189_v38 = vrot.slane %v188_v25, 2  ;;  %v255_v41 = vsub.f32 %v1736_v48, %v247_v33  ;;  %v210_v9 = vmax.f32 %v208_v0, %v209_v7 }
  0x34   :  { %v196_v51 = vmax.f32 %v194_v26, %v195_v39 }
  0x35   :  { %v136_v44 = vadd.f32 %v135_v42, %v132_v3  ;;  %v201_v42 = vrot.slane %v200_v34, 2  ;;  %v1821_v3 = vmax.f32 %v232_v31, %v233_v35  ;;  %v267_v55 = vmul.f32 1.442695, %v255_v41 }
  0x36   :  { %v197_v63 = vrot.slane %v196_v51, 1  ;;  %vm238_vm7 = vcmp.gt.f32.partialorder %v210_v9, -5e+29 }
  0x37   :  { %v140_v45 = vadd.f32 %v139_v43, %v136_v44  ;;  %v256_v43 = vsub.f32 %v1741_v49, %v248_v36  ;;  %v257_v44 = vsub.f32 %v1753_v53, %v249_v37  ;;  %v202_v56 = vmax.f32 %v200_v34, %v201_v42 }
  0x38   :  { %v250_v57 = vperm.slane %v1821_v3, 0  ;;  %1515 = vpow2.f32 %v267_v55  ;;  %v198_v5 = vmax.f32 %v196_v51, %v197_v63  ;;  %v242_v22 = vsel %vm238_vm7, %v210_v9, 0.0 }
  0x39   :  { %141 = vadd.xlane.f32.xlu0 %v140_v45  ;;  %v190_v45 = vmax.f32 %v188_v25, %v189_v38  ;;  %v269_v60 = vmul.f32 1.442695, %v256_v43  ;;  %v271_v61 = vmul.f32 1.442695, %v257_v44  ;;  %v203_v1 = vrot.slane %v202_v56, 1 }
  0x3a   :  { %v258_v2 = vsub.f32 %v1766_v59, %v250_v57  ;;  %vm236_vm12 = vcmp.gt.f32.partialorder %v198_v5, -5e+29  ;;  %v246_v31 = vperm.slane %v242_v22, 0  ;;  %vm525_vm7 = vcmp.eq.f32.partialorder %v1753_v53, %v1810_v30 }
  0x3b   :  { %v191_v62 = vrot.slane %v190_v45, 1  ;;  %1517 = vpow2.f32 %v269_v60  ;;  %v204_v6 = vmax.f32 %v202_v56, %v203_v1  ;;  %v240_v11 = vsel %vm236_vm12, %v198_v5, 0.0 }
  0x3c   :  { %1519 = vpow2.f32 %v271_v61  ;;  %v273_v8 = vmul.f32 1.442695, %v258_v2  ;;  %v244_v16 = vperm.slane %v240_v11, 0  ;;  %v254_v36 = vsub.f32 %v1807_v28, %v246_v31 }
  0x3d   :  { %v192_v4 = vmax.f32 %v190_v45, %v191_v62  ;;  %vm237_vm2 = vcmp.gt.f32.partialorder %v204_v6, -5e+29  ;;  %vm523_vm12 = vcmp.eq.f32.partialorder %v1736_v48, %v1789_v15 }
  0x3e   :  { %1521 = vpow2.f32 %v273_v8  ;;  %v1516_v12 = vpop.eup %1515  ;;  %v241_v13 = vsel %vm237_vm2, %v204_v6, 0.0  ;;  %v252_v26 = vsub.f32 %v1796_v18, %v244_v16  ;;  %v265_v44 = vmul.f32 1.442695, %v254_v36 }
  0x3f   :  { %vm235_vm11 = vcmp.gt.f32.partialorder %v192_v4, -5e+29  ;;  %v245_v24 = vperm.slane %v241_v13, 0  ;;  %v299_v27 = vrot.slane %v1516_v12, 4  ;;  %vm524_vm2 = vcmp.eq.f32.partialorder %v1741_v49, %v1798_v20 }
  0x40   :  { %v239_v10 = vsel %vm235_vm11, %v192_v4, 0.0  ;;  %v261_v38 = vmul.f32 1.442695, %v252_v26 }
  0x41   :  { %v243_v14 = vperm.slane %v239_v10, 0  ;;  %v1518_v21 = vpop.eup %1517  ;;  %v253_v33 = vsub.f32 %v1803_v23, %v245_v24  ;;  %v300_v34 = vadd.f32 %v1516_v12, %v299_v27 }
  0x42   :  { %v1520_v29 = vpop.eup %1519  ;;  %v305_v32 = vrot.slane %v1518_v21, 4 }
  0x43   :  { %v251_v25 = vsub.f32 %v1794_v17, %v243_v14  ;;  %v311_v35 = vrot.slane %v1520_v29, 4  ;;  %v263_v41 = vmul.f32 1.442695, %v253_v33  ;;  %v301_v42 = vrot.slane %v300_v34, 2 }
  0x44   :  { %v306_v39 = vadd.f32 %v1518_v21, %v305_v32  ;;  %v1522_v40 = vpop.eup %1521 }
  0x45   :  { %v259_v37 = vmul.f32 1.442695, %v251_v25  ;;  %v312_v43 = vadd.f32 %v1520_v29, %v311_v35  ;;  %v302_v17 = vadd.f32 %v301_v42, %v300_v34  ;;  %v317_v51 = vrot.slane %v1522_v40, 4 }
  0x46   :  { %v307_v45 = vrot.slane %v306_v39, 2 }
  0x47   :  { %1523 = vpow2.f32 %v259_v37  ;;  %v313_v18 = vrot.slane %v312_v43, 2  ;;  %v303_v52 = vrot.slane %v302_v17, 1  ;;  %v318_v28 = vadd.f32 %v1522_v40, %v317_v51 }
  0x48   :  { %1525 = vpow2.f32 %v261_v38  ;;  %v308_v23 = vadd.f32 %v307_v45, %v306_v39 }
  0x49   :  { %1527 = vpow2.f32 %v263_v41  ;;  %v314_v55 = vadd.f32 %v313_v18, %v312_v43  ;;  %v304_v57 = vadd.f32 %v303_v52, %v302_v17  ;;  %v319_v61 = vrot.slane %v318_v28, 2 }
  0x4a   :  { %1529 = vpow2.f32 %v265_v44  ;;  %v309_v56 = vrot.slane %v308_v23, 1 }
  0x4b   :  { %v315_v60 = vrot.slane %v314_v55, 1  ;;  %v320_v4 = vadd.f32 %v319_v61, %v318_v28  ;;  %1531 = vlog2.f32 %v304_v57 }
  0x4c   :  { %v310_v63 = vadd.f32 %v309_v56, %v308_v23 }
  0x4d   :  { %v1831_v62 = vpop.eup %1523  ;;  %v316_v2 = vadd.f32 %v315_v60, %v314_v55  ;;  %v321_v10 = vrot.slane %v320_v4, 1 }
  0x4e   :  { %v1833_v0 = vpop.eup %1525  ;;  %v275_v1 = vrot.slane %v1831_v62, 4  ;;  %1533 = vlog2.f32 %v310_v63  ;;  %v1855_v63 = vld [vmem:[%s2422_s1 + $0x80] sm:$0xff] }
  0x4f   :  { %v1836_v5 = vpop.eup %1527  ;;  %v281_v7 = vrot.slane %v1833_v0, 4  ;;  %1535 = vlog2.f32 %v316_v2  ;;  %v322_v16 = vadd.f32 %v321_v10, %v320_v4 }
  0x50   :  { %v1839_v6 = vpop.eup %1529  ;;  %v276_v8 = vadd.f32 %v1831_v62, %v275_v1  ;;  %v287_v9 = vrot.slane %v1836_v5, 4  ;;  %v1860_v1 = vld [vmem:[%s2422_s1 + $0x88] sm:$0xff] }
  0x51   :  { %v282_v11 = vadd.f32 %v1833_v0, %v281_v7  ;;  %v293_v12 = vrot.slane %v1839_v6, 4  ;;  %v1532_v24 = vpop.eup %1531  ;;  %1537 = vlog2.f32 %v322_v16  ;;  %v1872_v7 = vld [vmem:[%s2422_s1] sm:$0xff] }
  0x52   :  { %v277_v13 = vrot.slane %v276_v8, 2  ;;  %v288_v14 = vadd.f32 %v1836_v5, %v287_v9  ;;  %v340_v35 = vmul.f32 0.6931472, %v1532_v24  ;;  %v351_v16 = vmul.f32 2.0, %v1872_v7  ;;  %v1901_v24 = vld [vmem:[%s2422_s1 + $0x18] sm:$0xff] }
  0x53   :  { %v283_v21 = vrot.slane %v282_v11, 2  ;;  %v294_v22 = vadd.f32 %v1839_v6, %v293_v12 }
  0x54   :  { %v278_v27 = vadd.f32 %v277_v13, %v276_v8  ;;  %v289_v29 = vrot.slane %v288_v14, 2  ;;  %v1534_v31 = vpop.eup %1533  ;;  %v347_v17 = vadd.f32 %v340_v35, %v1789_v15  ;;  %v1877_v8 = vld [vmem:[%s2422_s1 + $0x8] sm:$0xff]  ;;  %v1890_v13 = vld [vmem:[%s2422_s1 + $0x98] sm:$0xff] }
  0x55   :  { %v284_v25 = vadd.f32 %v283_v21, %v282_v11  ;;  %v295_v26 = vrot.slane %v294_v22, 2  ;;  %v1536_v32 = vpop.eup %1535  ;;  %v342_v36 = vmul.f32 0.6931472, %v1534_v31  ;;  %v352_v21 = vmul.f32 2.0, %v1877_v8 }
  0x56   :  { %v279_v33 = vrot.slane %v278_v27, 1  ;;  %v290_v34 = vadd.f32 %v289_v29, %v288_v14  ;;  %v344_v41 = vmul.f32 0.6931472, %v1536_v32  ;;  %v363_v60 = vsub.f32 %v1725_v46, %v347_v17  ;;  %v1867_v46 = vld [vmem:[%s2422_s1 + $0x90] sm:$0xff] }
  0x57   :  { %v285_v37 = vrot.slane %v284_v25, 1  ;;  %v296_v38 = vadd.f32 %v295_v26, %v294_v22  ;;  %v1538_v44 = vpop.eup %1537  ;;  %v348_v18 = vadd.f32 %v342_v36, %v1798_v20  ;;  %v1589_v29 = vmov 1.0  }
  0x58   :  { %v280_v39 = vadd.f32 %v279_v33, %v278_v27  ;;  %v291_v40 = vrot.slane %v290_v34, 1  ;;  %v349_v55 = vadd.f32 %v344_v41, %v1810_v30  ;;  %v346_v56 = vmul.f32 0.6931472, %v1538_v44 }
  0x59   :  { %v286_v42 = vadd.f32 %v285_v37, %v284_v25  ;;  %v297_v43 = vrot.slane %v296_v38, 1  ;;  %v364_v61 = vsub.f32 %v1730_v47, %v348_v18  ;;  %v367_v10 = vmul.f32 %v363_v60, %v1855_v63 }
  0x5a   :  { %v292_v45 = vadd.f32 %v291_v40, %v290_v34  ;;  %vm323_vm8 = vcmp.gt.f32.partialorder %v280_v39, 0.0  ;;  %v350_v2 = vadd.f32 %v346_v56, %v1821_v3  ;;  %v365_v4 = vsub.f32 %v1746_v50, %v349_v55  ;;  %v1882_v50 = vld [vmem:[%s2422_s1 + $0x10] sm:$0xff] }
  0x5b   :  { %v298_v51 = vadd.f32 %v297_v43, %v296_v38  ;;  %vm324_vm9 = vcmp.gt.f32.partialorder %v286_v42, 0.0  ;;  %v327_v23 = vsel %vm323_vm8, %v280_v39, 1.0  ;;  %v368_v11 = vmul.f32 %v364_v61, %v1860_v1 }
  0x5c   :  { %vm325_vm10 = vcmp.gt.f32.partialorder %v292_v45, 0.0  ;;  %v328_v52 = vsel %vm324_vm9, %v286_v42, 1.0  ;;  %1539 = vrcp.f32 %v327_v23  ;;  %v366_v9 = vsub.f32 %v1758_v54, %v350_v2 }
  0x5d   :  { %vm326_vm11 = vcmp.gt.f32.partialorder %v298_v51, 0.0  ;;  %v329_v28 = vsel %vm325_vm10, %v292_v45, 1.0  ;;  %1541 = vrcp.f32 %v328_v52  ;;  %v353_v22 = vmul.f32 2.0, %v1882_v50 }
  0x5e   :  { %v330_v57 = vsel %vm326_vm11, %v298_v51, 1.0  ;;  %1543 = vrcp.f32 %v329_v28  ;;  %v1434_v27 = vsel %vm169_vm6, 1.0, %v1587_v19  ;;  %v369_v25 = vmul.f32 %v365_v4, %v1867_v46 }
  0x5f   :  { %1545 = vrcp.f32 %v330_v57  ;;  %v354_v33 = vmul.f32 2.0, %v1901_v24  ;;  %v370_v37 = vmul.f32 %v366_v9, %v1890_v13  ;;  %v427_v39 = vrot.slane %v367_v10, 4 }
  0x60   :  { %v433_v40 = vrot.slane %v368_v11, 4  ;;  %v439_v42 = vrot.slane %v369_v25, 4  ;;  %vm893_vm6 = vcmask 7168   ;;  %vm526_vm8 = vcmp.eq.f32.partialorder %v1766_v59, %v1821_v3 }
  0x61   :  { %v445_v17 = vrot.slane %v370_v37, 4  ;;  %v428_v23 = vadd.f32 %v427_v39, %v367_v10 }
  0x62   :  { %v1540_v47 = vpop.eup %1539  ;;  %v434_v52 = vadd.f32 %v433_v40, %v368_v11  ;;  %v440_v28 = vadd.f32 %v439_v42, %v369_v25 }
  0x63   :  { %v1542_v12 = vpop.eup %1541  ;;  %v1893_v14 = vmul.f32 %v1540_v47, %v1831_v62  ;;  %v173_v62 = vsel %vm109_vm14, 0.1, %v1589_v29  ;;  %v446_v61 = vadd.f32 %v445_v17, %v370_v37  ;;  %v429_v4 = vrot.slane %v428_v23, 2 }
  0x64   :  { %v1544_v54 = vpop.eup %1543  ;;  %v1909_v31 = vmul.f32 %v1542_v12, %v1833_v0  ;;  %v174_v38 = vmul.f32 %v1434_v27, %v173_v62  ;;  %v435_v47 = vrot.slane %v434_v52, 2 }
  0x65   :  { %v1546_v26 = vpop.eup %1545  ;;  %v1913_v32 = vmul.f32 %v1544_v54, %v1836_v5  ;;  %v355_v34 = vmul.f32 %v351_v16, %v1893_v14  ;;  %v447_v11 = vrot.slane %v446_v61, 2  ;;  %v430_v62 = vadd.f32 %v429_v4, %v428_v23 }
  0x66   :  { %v1918_v35 = vmul.f32 %v1546_v26, %v1839_v6  ;;  %v356_v36 = vmul.f32 %v352_v21, %v1909_v31  ;;  %v1927_v6 = vld [vmem:[%s2422_s1 + $0xa0] ss:$8 sm:$0xf]  ;;  %v371_v18 = vmul.f32 %v174_v38, %v1855_v63  ;;  %v372_v51 = vmul.f32 %v174_v38, %v1860_v1 }
  0x67   :  { %v357_v0 = vmul.f32 %v353_v22, %v1913_v32  ;;  %v379_v5 = vrot.slane %v355_v34, 4  ;;  %v634_v2 = vand.u32 2147483647, %v1927_v6  ;;  %v373_v16 = vmul.f32 %v174_v38, %v1867_v46 }
  0x68   :  { %v358_v41 = vmul.f32 %v354_v33, %v1918_v35  ;;  %v385_v43 = vrot.slane %v356_v36, 4  ;;  %v451_v9 = vrot.slane %v371_v18, 4  ;;  %v457_v12 = vrot.slane %v372_v51, 4 }
  0x69   :  { %v391_v44 = vrot.slane %v357_v0, 4  ;;  %v380_v55 = vadd.f32 %v379_v5, %v355_v34  ;;  %v441_v22 = vrot.slane %v440_v28, 2  ;;  %v635_v29 = vsub.f32 0.0, %v634_v2 }
  0x6a   :  { %v397_v45 = vrot.slane %v358_v41, 4  ;;  %v386_v56 = vadd.f32 %v385_v43, %v356_v36  ;;  %v436_v25 = vadd.f32 %v435_v47, %v434_v52  ;;  %v452_v26 = vadd.f32 %v451_v9, %v371_v18 }
  0x6b   :  { %v392_v57 = vadd.f32 %v391_v44, %v357_v0  ;;  %v381_v21 = vrot.slane %v380_v55, 2  ;;  %v458_v33 = vadd.f32 %v457_v12, %v372_v51  ;;  %v1934_v34 = vcvt.s32.f32 %v1684_v58 }
  0x6c   :  { %v398_v60 = vadd.f32 %v397_v45, %v358_v41  ;;  %v387_v54 = vrot.slane %v386_v56, 2  ;;  %v442_v37 = vadd.f32 %v441_v22, %v440_v28  ;;  %v463_v0 = vrot.slane %v373_v16, 4 }
  0x6d   :  { %v393_v27 = vrot.slane %v392_v57, 2  ;;  %v382_v36 = vadd.f32 %v381_v21, %v380_v55  ;;  %v374_v39 = vmul.f32 %v174_v38, %v1890_v13  ;;  %v448_v42 = vadd.f32 %v447_v11, %v446_v61 }
  0x6e   :  { %v399_v10 = vrot.slane %v398_v60, 2  ;;  %v388_v40 = vadd.f32 %v387_v54, %v386_v56  ;;  %v1937_v43 = vmul.f32 1.442695, %v635_v29  ;;  %v431_v44 = vrot.slane %v430_v62, 1 }
  0x6f   :  { %v394_v41 = vadd.f32 %v393_v27, %v392_v57  ;;  %v437_v45 = vrot.slane %v436_v25, 1  ;;  %v453_v17 = vrot.slane %v452_v26, 2  ;;  %v459_v23 = vrot.slane %v458_v33, 2 }
  0x70   :  { %v400_v5 = vadd.f32 %v399_v10, %v398_v60  ;;  %v375_v18 = vmul.f32 %v1934_v34, %v1855_v63  ;;  %v383_v51 = vrot.slane %v382_v36, 1  ;;  %v443_v52 = vrot.slane %v442_v37, 1 }
  0x71   :  { %v464_v55 = vadd.f32 %v463_v0, %v373_v16  ;;  %v376_v28 = vmul.f32 %v1934_v34, %v1860_v1  ;;  %v389_v38 = vrot.slane %v388_v40, 1  ;;  %v395_v56 = vrot.slane %v394_v41, 1 }
  0x72   :  { %v469_v57 = vrot.slane %v374_v39, 4  ;;  %v377_v60 = vmul.f32 %v1934_v34, %v1867_v46  ;;  %v378_v61 = vmul.f32 %v1934_v34, %v1890_v13  ;;  %v401_v2 = vrot.slane %v400_v5, 1 }
  0x73   :  { %v449_v4 = vrot.slane %v448_v42, 1  ;;  %v1947_v47 = vadd.f32 %v431_v44, %v430_v62  ;;  %v1949_v9 = vadd.f32 %v437_v45, %v436_v25  ;;  %v454_v12 = vadd.f32 %v453_v17, %v452_v26 }
  0x74   :  { %v460_v16 = vadd.f32 %v459_v23, %v458_v33  ;;  %v1951_v21 = vadd.f32 %v383_v51, %v382_v36  ;;  %v1953_v22 = vadd.f32 %v443_v52, %v442_v37  ;;  %v465_v54 = vrot.slane %v464_v55, 2 }
  0x75   :  { %v475_v27 = vrot.slane %v1855_v63, 4  ;;  %v1956_v10 = vadd.f32 %v389_v38, %v388_v40  ;;  %v1958_v11 = vadd.f32 %v395_v56, %v394_v41  ;;  %v470_v29 = vadd.f32 %v469_v57, %v374_v39 }
  0x76   :  { %v481_v0 = vrot.slane %v1860_v1, 4  ;;  %v1961_v62 = vadd.f32 %v401_v2, %v400_v5  ;;  %v1963_v25 = vadd.f32 %v449_v4, %v448_v42  ;;  %v499_v26 = vrot.slane %v375_v18, 4 }
  0x77   :  { %v505_v33 = vrot.slane %v376_v28, 4  ;;  %v455_v36 = vrot.slane %v454_v12, 1  ;;  %v461_v37 = vrot.slane %v460_v16, 1  ;;  %v487_v44 = vrot.slane %v1867_v46, 4 }
  0x78   :  { %v511_v45 = vrot.slane %v377_v60, 4  ;;  %v1966_v17 = vadd.f32 %v465_v54, %v464_v55  ;;  %v476_v40 = vadd.f32 %v475_v27, %v1855_v63  ;;  %v493_v39 = vrot.slane %v1890_v13, 4 }
  0x79   :  { %v471_v41 = vrot.slane %v470_v29, 2  ;;  %v1973_v5 = vadd.f32 %v481_v0, %v1860_v1  ;;  %v500_v42 = vadd.f32 %v499_v26, %v375_v18  ;;  %v506_v23 = vadd.f32 %v505_v33, %v376_v28 }
  0x7a   :  { %v527_v63 = vsel %vm523_vm12, %v1934_v34, 1e+09  ;;  %v512_v51 = vadd.f32 %v511_v45, %v377_v60  ;;  %v517_v52 = vrot.slane %v378_v61, 4  ;;  %v528_v48 = vsel %vm524_vm2, %v1934_v34, 1e+09 }
  0x7b   :  { %v529_v15 = vsel %vm525_vm7, %v1934_v34, 1e+09  ;;  %v1984_v1 = vadd.f32 %v455_v36, %v454_v12  ;;  %v1986_v55 = vadd.f32 %v461_v37, %v460_v16  ;;  %v1989_v49 = vadd.f32 %v487_v44, %v1867_v46 }
  0x7c   :  { %v531_v53 = vrot.slane %v527_v63, 4  ;;  %v477_v20 = vrot.slane %v476_v40, 2  ;;  %v530_v30 = vsel %vm526_vm8, %v1934_v34, 1e+09  ;;  %v537_v59 = vrot.slane %v528_v48, 4 }
  0x7d   :  { %v543_v3 = vrot.slane %v529_v15, 4  ;;  %v494_v18 = vadd.f32 %v493_v39, %v1890_v13  ;;  %v501_v28 = vrot.slane %v500_v42, 2  ;;  %v507_v38 = vrot.slane %v506_v23, 2 }
  0x7e   :  { %v532_v56 = vmin.f32 %v527_v63, %v531_v53  ;;  %v513_v60 = vrot.slane %v512_v51, 2  ;;  %v518_v2 = vadd.f32 %v517_v52, %v378_v61  ;;  %v538_v4 = vmin.f32 %v528_v48, %v537_v59 }
  0x7f   :  { %v544_v12 = vmin.f32 %v529_v15, %v543_v3  ;;  %v549_v16 = vrot.slane %v530_v30, 4  ;;  %v467_v0 = vrot.slane %v1966_v17, 1  ;;  %v472_v26 = vadd.f32 %v471_v41, %v470_v29 }
  0x80   :  { %v483_v33 = vrot.slane %v1973_v5, 2  ;;  %v502_v36 = vadd.f32 %v501_v28, %v500_v42  ;;  %v533_v37 = vrot.slane %v532_v56, 2  ;;  %v508_v44 = vadd.f32 %v507_v38, %v506_v23 }
  0x81   :  { %v519_v45 = vrot.slane %v518_v2, 2  ;;  %v539_v39 = vrot.slane %v538_v4, 2  ;;  %v545_v63 = vrot.slane %v544_v12, 2  ;;  %v489_v52 = vrot.slane %v1989_v49, 2 }
  0x82   :  { %v514_v48 = vadd.f32 %v513_v60, %v512_v51  ;;  %v534_v15 = vmin.f32 %v532_v56, %v533_v37  ;;  %v550_v53 = vmin.f32 %v530_v30, %v549_v16  ;;  %v478_v59 = vadd.f32 %v477_v20, %v476_v40 }
  0x83   :  { %v495_v3 = vrot.slane %v494_v18, 2  ;;  %v503_v42 = vrot.slane %v502_v36, 1  ;;  %v509_v28 = vrot.slane %v508_v44, 1  ;;  %v520_v30 = vadd.f32 %v519_v45, %v518_v2 }
  0x84   :  { %v551_v23 = vrot.slane %v550_v53, 2  ;;  %1547 = vpow2.f32 %v1937_v43  ;;  %v515_v40 = vrot.slane %v514_v48, 1  ;;  %v535_v20 = vrot.slane %v534_v15, 1 }
  0x85   :  { %vm567_vm9 = vcmp.gt.f32.partialorder %v1927_v6, 0.0  ;;  %v2025_v16 = vadd.f32 %v467_v0, %v1966_v17  ;;  %v484_v43 = vadd.f32 %v483_v33, %v1973_v5  ;;  %v490_v2 = vadd.f32 %v489_v52, %v1989_v49  ;;  %v1432_v17 = vld [vmem:[%s2422_s1 + $0xa1] ss:$8 sm:$0xf] }
  0x86   :  { %v521_v37 = vrot.slane %v520_v30, 1  ;;  %v510_v45 = vadd.f32 %v509_v28, %v508_v44  ;;  %v479_v5 = vrot.slane %v478_v59, 1  ;;  %v516_v0 = vadd.f32 %v515_v40, %v514_v48 }
  0x87   :  { %v485_v52 = vrot.slane %v484_v43, 1  ;;  %v647_v48 = vmul.f32 %v1432_v17, %v1927_v6 }
  0xac   :  { %v1993_v57 = vpop.xlane.xlu0 %141 }
  0xad   :  { %v926_v46 = vsel %vm121_vm0, %v1993_v57, 0.0  ;;  %v904_v34 = vsel %vm113_vm13, %v1993_v57, 0.0  ;;  %v892_v13 = vsel %vm109_vm14, %v1993_v57, 0.0  ;;  %v937_v29 = vsel %vm125_vm1, %v1993_v57, 0.0 }
  0xae   :  { %v927_v54 = vsel %vm893_vm6, %v926_v46, 0.0  ;;  %v905_v27 = vsel %vm893_vm6, %v904_v34, 0.0  ;;  %v894_v61 = vsel %vm893_vm6, %v892_v13, 0.0  ;;  %v540_v46 = vmin.f32 %v538_v4, %v539_v39 }
  0xaf   :  { %928 = vadd.xlane.f32.xlu2 %v927_v54  ;;  %906 = vadd.xlane.f32.xlu1 %v905_v27  ;;  %v546_v34 = vmin.f32 %v544_v12, %v545_v63  ;;  %v915_v41 = vsel %vm117_vm15, %v1993_v57, 0.0  ;;  %v948_v51 = vsel %vm129_vm3, %v1993_v57, 0.0  ;;  %v938_v56 = vsel %vm893_vm6, %v937_v29, 0.0  ;;  %v1548_v29 = vpop.eup %1547 }
  0xb0   :  { %895 = vadd.xlane.f32.xlu0 %v894_v61  ;;  %v541_v38 = vrot.slane %v540_v46, 1  ;;  %v916_v60 = vsel %vm893_vm6, %v915_v41, 0.0  ;;  %v552_v12 = vmin.f32 %v550_v53, %v551_v23  ;;  %v949_v13 = vsel %vm893_vm6, %v948_v51, 0.0 }
  0xb1   :  { %v547_v4 = vrot.slane %v546_v34, 1  ;;  %v473_v54 = vrot.slane %v472_v26, 1  ;;  %v496_v27 = vadd.f32 %v495_v3, %v494_v18  ;;  %v504_v61 = vadd.f32 %v503_v42, %v502_v36 }
  0xb2   :  { %v536_v39 = vmin.f32 %v534_v15, %v535_v20  ;;  %v542_v63 = vmin.f32 %v540_v46, %v541_v38  ;;  %v1435_v53 = vsel %vm567_vm9, 1.0, %v1587_v19  ;;  %v553_v33 = vrot.slane %v552_v12, 1 }
  0xb3   :  { %v548_v49 = vmin.f32 %v546_v34, %v547_v4  ;;  %v491_v18 = vrot.slane %v490_v2, 1  ;;  %v639_v36 = vmul.f32 0.5, %v1548_v29  ;;  %v642_v3 = vadd.f32 1.0, %v1548_v29 }
  0xb4   :  { %v2035_v44 = vadd.f32 %v473_v54, %v472_v26  ;;  %v497_v15 = vrot.slane %v496_v27, 1  ;;  %v522_v46 = vadd.f32 %v521_v37, %v520_v30  ;;  %vm570_vm10 = vcmp.eq.f32.partialorder %v1435_v53, %v1432_v17 }
  0xb5   :  { %vm555_vm11 = vcmp.eq.f32.partialorder %v536_v39, %v504_v61  ;;  %vm556_vm12 = vcmp.eq.f32.partialorder %v542_v63, %v510_v45  ;;  %1549 = vlog2.f32 %v642_v3  ;;  %v646_v41 = vmax.f32 %v1927_v6, 0.0  ;;  %v1433_v6 = vld [vmem:[%s2422_s1 + $0xa2] ss:$8 sm:$0xf] }
  0xb6   :  { %v554_v42 = vmin.f32 %v552_v12, %v553_v33  ;;  %vm557_vm2 = vcmp.eq.f32.partialorder %v548_v49, %v516_v0  ;;  %v640_v23 = vsub.f32 1.0, %v639_v36  ;;  %v2039_v34 = vadd.f32 %v479_v5, %v478_v59 }
  0xb7   :  { %939 = vadd.xlane.f32.xlu2 %v938_v56  ;;  %917 = vadd.xlane.f32.xlu1 %v916_v60  ;;  %v2041_v51 = vadd.f32 %v485_v52, %v484_v43  ;;  %v2043_v28 = vadd.f32 %v491_v18, %v490_v2  ;;  %v571_v26 = vsel %vm570_vm10, 1.0, %v1587_v19  ;;  %v559_v30 = vsel %vm555_vm11, 1.0, %v1587_v19 }
  0xb8   :  { %950 = vadd.xlane.f32.xlu0 %v949_v13  ;;  %v560_v40 = vsel %vm556_vm12, 1.0, %v1587_v19  ;;  %v651_v20 = vsub.f32 0.0, %v1947_v47  ;;  %v652_v38 = vsub.f32 0.0, %v1949_v9  ;;  %v2053_v59 = vadd.f32 %v497_v15, %v496_v27 }
  0xb9   :  { %v561_v56 = vsel %vm557_vm2, 1.0, %v1587_v19  ;;  %v2057_v60 = vmul.f32 0.0, %v1958_v11  ;;  %v653_v4 = vsub.f32 0.0, %v1953_v22  ;;  %vm558_vm7 = vcmp.eq.f32.partialorder %v554_v42, %v522_v46 }
  0xba   :  { %v572_v12 = vmul.f32 %v1433_v6, %v571_v26  ;;  %v641_v13 = vmul.f32 %v1548_v29, %v640_v23  ;;  %v648_v43 = vsub.f32 %v646_v41, %v647_v48  ;;  %v2061_v9 = vmul.f32 %v559_v30, %v2039_v34 }
  0xbb   :  { %v1550_v47 = vpop.eup %1549  ;;  %v2064_v2 = vmul.f32 %v560_v40, %v2041_v51  ;;  %vm638_vm8 = vcmp.lt.f32.partialorder %v1548_v29, 0.0001  ;;  %v654_v54 = vsub.f32 0.0, %v1963_v25  ;;  %v2068_v27 = vmul.f32 %v561_v56, %v2043_v28 }
  0xbc   :  { %v644_v61 = vmul.f32 0.6931472, %v1550_v47  ;;  %v655_v22 = vmul.f32 %v651_v20, %v1984_v1  ;;  %v656_v37 = vmul.f32 %v652_v38, %v1986_v55  ;;  %v562_v45 = vsel %vm558_vm7, 1.0, %v1587_v19 }
  0xbd   :  { %v657_v39 = vmul.f32 %v653_v4, %v2025_v16  ;;  %v688_v63 = vperm.slane %v1433_v6, 0  ;;  %v689_v53 = vperm.slane %v1433_v6, 1  ;;  %v690_v5 = vperm.slane %v1433_v6, 2 }
  0xbe   :  { %v645_v17 = vsel %vm638_vm8, %v641_v13, %v644_v61  ;;  %v691_v0 = vperm.slane %v1433_v6, 3  ;;  %v714_v29 = vperm.slane %v572_v12, 0  ;;  %v715_v25 = vperm.slane %v572_v12, 1 }
  0xbf   :  { %v649_v49 = vadd.f32 %v648_v43, %v645_v17  ;;  %v959_v33 = vsel %vm133_vm4, %v1993_v57, 0.0  ;;  %v970_v52 = vsel %vm137_vm5, %v1993_v57, 0.0  ;;  %v716_v18 = vperm.slane %v572_v12, 2 }
  0xc0   :  { %v717_v19 = vperm.slane %v572_v12, 3  ;;  %v960_v36 = vsel %vm893_vm6, %v959_v33, 0.0  ;;  %v971_v3 = vsel %vm893_vm6, %v970_v52, 0.0  ;;  %v566_v15 = vmul.f32 %v562_v45, %v2053_v59 }
  0xc1   :  { %v2084_v46 = vmul.f32 0.0, %v1961_v62  ;;  %v650_v41 = vmul.f32 %v1433_v6, %v649_v49  ;;  %v658_v42 = vmul.f32 %v654_v54, %v2035_v44  ;;  %961 = vadd.xlane.f32.xlu1 %v960_v36  ;;  %972 = vadd.xlane.f32.xlu0 %v971_v3  ;;  %v696_v23 = vsel %vm113_vm13, %v688_v63, 0.0 }
  0xc2   :  { %v697_v57 = vsel %vm113_vm13, %v689_v53, 0.0  ;;  %v698_v48 = vsel %vm113_vm13, %v690_v5, 0.0  ;;  %v699_v26 = vsel %vm113_vm13, %v691_v0, 0.0  ;;  %v722_v6 = vsel %vm117_vm15, %v714_v29, 0.0 }
  0xc3   :  { %v662_v30 = vperm.slane %v650_v41, 0  ;;  %v663_v40 = vperm.slane %v650_v41, 1  ;;  %v664_v20 = vperm.slane %v650_v41, 2  ;;  %v665_v38 = vperm.slane %v650_v41, 3 }
  0xc4   :  { %v723_v56 = vsel %vm117_vm15, %v715_v25, 0.0  ;;  %v724_v4 = vsel %vm117_vm15, %v716_v18, 0.0  ;;  %v725_v12 = vsel %vm117_vm15, %v717_v19, 0.0  ;;  %v739_v17 = vsel %vm121_vm0, %v655_v22, 0.0 }
  0xc5   :  { %v670_v13 = vsel %vm109_vm14, %v662_v30, 0.0  ;;  %v671_v43 = vsel %vm109_vm14, %v663_v40, 0.0  ;;  %v672_v47 = vsel %vm109_vm14, %v664_v20, 0.0  ;;  %v673_v54 = vsel %vm109_vm14, %v665_v38, 0.0 }
  0xc6   :  { %v704_v61 = vadd.f32 %v696_v23, %v670_v13  ;;  %v705_v45 = vadd.f32 %v697_v57, %v671_v43  ;;  %v706_v63 = vadd.f32 %v698_v48, %v672_v47  ;;  %v707_v53 = vadd.f32 %v699_v26, %v673_v54 }
  0xc7   :  { %v740_v5 = vsel %vm121_vm0, %v656_v37, 0.0  ;;  %v741_v0 = vsel %vm121_vm0, %v657_v39, 0.0  ;;  %v742_v29 = vsel %vm121_vm0, %v658_v42, 0.0  ;;  %v756_v18 = vsel %vm125_vm1, %v1984_v1, 0.0 }
  0xc8   :  { %v730_v49 = vadd.f32 %v722_v6, %v704_v61  ;;  %v731_v25 = vadd.f32 %v723_v56, %v705_v45  ;;  %v732_v33 = vadd.f32 %v724_v4, %v706_v63  ;;  %v733_v52 = vadd.f32 %v725_v12, %v707_v53 }
  0xc9   :  { %v757_v22 = vsel %vm125_vm1, %v1986_v55, 0.0  ;;  %v758_v37 = vsel %vm125_vm1, %v2025_v16, 0.0  ;;  %v759_v39 = vsel %vm125_vm1, %v2035_v44, 0.0  ;;  %v773_v1 = vsel %vm129_vm3, %v2061_v9, 0.0 }
  0xca   :  { %v747_v19 = vadd.f32 %v739_v17, %v730_v49  ;;  %v748_v36 = vadd.f32 %v740_v5, %v731_v25  ;;  %v749_v3 = vadd.f32 %v741_v0, %v732_v33  ;;  %v750_v41 = vadd.f32 %v742_v29, %v733_v52 }
  0xcb   :  { %v774_v55 = vsel %vm129_vm3, %v2064_v2, 0.0  ;;  %v775_v16 = vsel %vm129_vm3, %v2068_v27, 0.0  ;;  %v776_v42 = vsel %vm129_vm3, %v566_v15, 0.0  ;;  %v790_v26 = vsel %vm133_vm4, %v2039_v34, 0.0 }
  0xcc   :  { %v764_v44 = vadd.f32 %v756_v18, %v747_v19  ;;  %v765_v23 = vadd.f32 %v757_v22, %v748_v36  ;;  %v766_v57 = vadd.f32 %v758_v37, %v749_v3  ;;  %v767_v48 = vadd.f32 %v759_v39, %v750_v41 }
  0xcd   :  { %v791_v9 = vsel %vm133_vm4, %v2041_v51, 0.0  ;;  %v792_v2 = vsel %vm133_vm4, %v2043_v28, 0.0  ;;  %v793_v27 = vsel %vm133_vm4, %v2053_v59, 0.0  ;;  %v807_v34 = vsel %vm137_vm5, %v1951_v21, 0.0 }
  0xce   :  { %v781_v15 = vadd.f32 %v773_v1, %v764_v44  ;;  %v782_v30 = vadd.f32 %v774_v55, %v765_v23  ;;  %v783_v40 = vadd.f32 %v775_v16, %v766_v57  ;;  %v784_v20 = vadd.f32 %v776_v42, %v767_v48 }
  0xcf   :  { %v808_v51 = vsel %vm137_vm5, %v1956_v10, 0.0  ;;  %v809_v28 = vsel %vm137_vm5, %v2057_v60, 0.0  ;;  %v810_v4 = vsel %vm137_vm5, %v2084_v46, 0.0 }
  0xd0   :  { %v798_v38 = vadd.f32 %v790_v26, %v781_v15  ;;  %v799_v6 = vadd.f32 %v791_v9, %v782_v30  ;;  %v800_v56 = vadd.f32 %v792_v2, %v783_v40  ;;  %v801_v59 = vadd.f32 %v793_v27, %v784_v20 }
  0xd2   :  { %v815_v12 = vadd.f32 %v807_v34, %v798_v38  ;;  %v816_v13 = vadd.f32 %v808_v51, %v799_v6  ;;  %v817_v43 = vadd.f32 %v809_v28, %v800_v56  ;;  %v818_v47 = vadd.f32 %v810_v4, %v801_v59 }
  0xd4   :  { %v877_v54 = vadd.f32 %v816_v13, %v815_v12 }
  0xd6   :  { %v878_v61 = vadd.f32 %v877_v54, %v817_v43 }
  0xd8   :  { %v879_v45 = vadd.f32 %v878_v61, %v818_v47 }
  0xda   :  { %880 = vadd.xlane.f32.xlu2 %v879_v45 }
 0x122   :  { %v929_v63 = vpop.xlane.xlu2 %928  ;;  %v907_v53 = vpop.xlane.xlu1 %906 }
 0x123   :  { %v908_v17 = vrot.slane %v907_v53, 4  ;;  %v896_v60 = vpop.xlane.xlu0 %895  ;;  %v930_v29 = vrot.slane %v929_v63, 4 }
 0x124   :  { %v897_v5 = vrot.slane %v896_v60, 4 }
 0x125   :  { %v909_v0 = vadd.f32 %v908_v17, %v907_v53  ;;  %v931_v46 = vadd.f32 %v930_v29, %v929_v63 }
 0x126   :  { %v898_v49 = vadd.f32 %v897_v5, %v896_v60 }
 0x127   :  { %v910_v25 = vrot.slane %v909_v0, 2  ;;  %v932_v44 = vrot.slane %v931_v46, 2 }
 0x128   :  { %v899_v33 = vrot.slane %v898_v49, 2 }
 0x129   :  { %v911_v52 = vadd.f32 %v910_v25, %v909_v0  ;;  %v933_v2 = vadd.f32 %v932_v44, %v931_v46 }
 0x12a   :  { %v940_v18 = vpop.xlane.xlu2 %939  ;;  %v918_v22 = vpop.xlane.xlu1 %917  ;;  %v900_v37 = vadd.f32 %v899_v33, %v898_v49 }
 0x12b   :  { %v941_v39 = vrot.slane %v940_v18, 4  ;;  %v919_v19 = vrot.slane %v918_v22, 4  ;;  %v951_v36 = vpop.xlane.xlu0 %950  ;;  %v912_v3 = vrot.slane %v911_v52, 1  ;;  %v934_v40 = vrot.slane %v933_v2, 1 }
 0x12c   :  { %v952_v41 = vrot.slane %v951_v36, 4  ;;  %v901_v1 = vrot.slane %v900_v37, 1 }
 0x12d   :  { %v942_v55 = vadd.f32 %v941_v39, %v940_v18  ;;  %v920_v16 = vadd.f32 %v919_v19, %v918_v22  ;;  %v913_v42 = vadd.f32 %v912_v3, %v911_v52  ;;  %v935_v6 = vadd.f32 %v934_v40, %v933_v2 }
 0x12e   :  { %v953_v23 = vadd.f32 %v952_v41, %v951_v36  ;;  %v902_v57 = vadd.f32 %v901_v1, %v900_v37  ;;  %v2218_v2 = vmul.f32 0.0, %v1951_v21 }
 0x12f   :  { %v943_v48 = vrot.slane %v942_v55, 2  ;;  %v921_v26 = vrot.slane %v920_v16, 2 }
 0x130   :  { %1436 = vpush %v902_v57  ;;  %v954_v9 = vrot.slane %v953_v23, 2 }
 0x131   :  { %1438 = vpush %v913_v42  ;;  %v922_v27 = vadd.f32 %v921_v26, %v920_v16  ;;  %v944_v15 = vadd.f32 %v943_v48, %v942_v55 }
 0x132   :  { %v955_v30 = vadd.f32 %v954_v9, %v953_v23 }
 0x133   :  { %v923_v20 = vrot.slane %v922_v27, 1  ;;  %v945_v34 = vrot.slane %v944_v15, 1 }
 0x134   :  { %v956_v51 = vrot.slane %v955_v30, 1  ;;  %v962_v59 = vpop.xlane.xlu1 %961  ;;  %v973_v4 = vpop.xlane.xlu0 %972 }
 0x135   :  { %v924_v28 = vadd.f32 %v923_v20, %v922_v27  ;;  %v946_v38 = vadd.f32 %v945_v34, %v944_v15  ;;  %v963_v12 = vrot.slane %v962_v59, 4  ;;  %v974_v13 = vrot.slane %v973_v4, 4 }
 0x136   :  { %v957_v56 = vadd.f32 %v956_v51, %v955_v30  ;;  %v359_v27 = vadd.f32 %v1893_v14, %v1872_v7  ;;  %v360_v15 = vadd.f32 %v1909_v31, %v1877_v8  ;;  %v361_v30 = vadd.f32 %v1913_v32, %v1882_v50 }
 0x137   :  { %1440 = vpush %v924_v28  ;;  %v964_v43 = vadd.f32 %v963_v12, %v962_v59  ;;  %v975_v47 = vadd.f32 %v974_v13, %v973_v4  ;;  %v362_v34 = vadd.f32 %v1918_v35, %v1901_v24  ;;  %v2236_v32 = vmul.f32 0.0, %v1956_v10 }
 0x138   :  { %1442 = vpush %v935_v6  ;;  %v403_v50 = vrot.slane %v359_v27, 4  ;;  %v409_v31 = vrot.slane %v360_v15, 4  ;;  %v415_v28 = vrot.slane %v361_v30, 4 }
 0x139   :  { %1444 = vpush %v946_v38  ;;  %v965_v54 = vrot.slane %v964_v43, 2  ;;  %v976_v61 = vrot.slane %v975_v47, 2  ;;  %v421_v24 = vrot.slane %v362_v34, 4 }
 0x13a   :  { %1446 = vpush %v957_v56  ;;  %v404_v6 = vadd.f32 %v403_v50, %v359_v27  ;;  %v410_v56 = vadd.f32 %v409_v31, %v360_v15  ;;  %v416_v4 = vadd.f32 %v415_v28, %v361_v30 }
 0x13b   :  { %v966_v45 = vadd.f32 %v965_v54, %v964_v43  ;;  %v977_v63 = vadd.f32 %v976_v61, %v975_v47  ;;  %v422_v12 = vadd.f32 %v421_v24, %v362_v34 }
 0x13c   :  { %v405_v47 = vrot.slane %v404_v6, 2  ;;  %v411_v54 = vrot.slane %v410_v56, 2 }
 0x13d   :  { %v967_v53 = vrot.slane %v966_v45, 1  ;;  %v978_v17 = vrot.slane %v977_v63, 1 }
 0x13f   :  { %v968_v60 = vadd.f32 %v967_v53, %v966_v45  ;;  %v979_v5 = vadd.f32 %v978_v17, %v977_v63  ;;  %v417_v63 = vrot.slane %v416_v4, 2  ;;  %v2254_v53 = vadd.s32 8, %v1684_v58 }
 0x141   :  { %1448 = vpush %v968_v60  ;;  %vm842_vm10 = vcmp.eq.s32.totalorder %v2254_v53, 9  ;;  %vm824_vm2 = vcmp.eq.s32.totalorder %v2254_v53, 8 }
 0x142   :  { %1450 = vpush %v979_v5  ;;  %v406_v5 = vadd.f32 %v405_v47, %v404_v6  ;;  %v850_v28 = vsel %vm842_vm10, %v1961_v62, 0.0 }
 0x14d   :  { %v881_v0 = vpop.xlane.xlu2 %880 }
 0x14e   :  { %v1117_v29 = vsel %vm109_vm14, %v881_v0, 0.0  ;;  %v1102_v49 = vsel %vm113_vm13, %v881_v0, 0.0  ;;  %v1151_v25 = vsel %vm117_vm15, %v881_v0, 0.0  ;;  %v1197_v18 = vsel %vm125_vm1, %v881_v0, 0.0 }
 0x14f   :  { %v1119_v33 = vsel %vm893_vm6, %v1117_v29, 0.0  ;;  %v1104_v52 = vsel %vm893_vm6, %v1102_v49, 0.0  ;;  %v1153_v46 = vsel %vm893_vm6, %v1151_v25, 0.0  ;;  %v1183_v22 = vsel %vm121_vm0, %v881_v0, 0.0 }
 0x150   :  { %1122 = vadd.xlane.f32.xlu2 %v1119_v33  ;;  %1108 = vadd.xlane.f32.xlu1 %v1104_v52  ;;  %v1231_v37 = vsel %vm129_vm3, %v881_v0, 0.0  ;;  %v1199_v39 = vsel %vm893_vm6, %v1197_v18, 0.0  ;;  %v1185_v19 = vsel %vm893_vm6, %v1183_v22, 0.0  ;;  %v1245_v3 = vsel %vm133_vm4, %v881_v0, 0.0 }
 0x151   :  { %1156 = vadd.xlane.f32.xlu0 %v1153_v46  ;;  %v1233_v36 = vsel %vm893_vm6, %v1231_v37, 0.0  ;;  %v1279_v41 = vsel %vm137_vm5, %v881_v0, 0.0  ;;  %v1247_v1 = vsel %vm893_vm6, %v1245_v3, 0.0  ;;  %v412_v0 = vadd.f32 %v411_v54, %v410_v56 }
 0x152   :  { %v1281_v16 = vsel %vm893_vm6, %v1279_v41, 0.0  ;;  %v423_v29 = vrot.slane %v422_v12, 2  ;;  %v418_v25 = vadd.f32 %v417_v63, %v416_v4  ;;  %v407_v46 = vrot.slane %v406_v5, 1 }
 0x153   :  { %v413_v18 = vrot.slane %v412_v0, 1 }
 0x158   :  { %1202 = vadd.xlane.f32.xlu2 %v1199_v39  ;;  %1188 = vadd.xlane.f32.xlu1 %v1185_v19 }
 0x159   :  { %1236 = vadd.xlane.f32.xlu0 %v1233_v36  ;;  %v424_v36 = vadd.f32 %v423_v29, %v422_v12 }
 0x15b   :  { %v425_v15 = vrot.slane %v424_v36, 1 }
 0x160   :  { %1250 = vadd.xlane.f32.xlu1 %v1247_v1  ;;  %v408_v1 = vadd.f32 %v407_v46, %v406_v5 }
 0x161   :  { %s2184_s1 = spop %1436  ;;  %1284 = vadd.xlane.f32.xlu0 %v1281_v16 }
 0x162   :  { %s2186_s23 = spop %1438  ;;  %v829_v50 = vsel %vm824_vm2, %v408_v1, 0.0 }
 0x163   :  { %p981_p0 = scmp.gt.f32.partialorder %s2186_s23, 0.0 }
 0x165   :  { %s982_s24 = scalar_select %p981_p0, %s2186_s23, 1.0 }
 0x167   :  { %v983_v55 = vstv %s982_s24 }
 0x168   :  { %1551 = vrcp.f32 %v983_v55  ;;  %s2198_s25 = spop %1440  ;;  %v993_v48 = vand.u32 2147483647, %v983_v55  ;;  %v995_v26 = vand.u32 2147483648, %v983_v55  ;;  %vm989_vm14 = vweird.f32 %v983_v55 }
 0x169   :  { %s2200_s26 = spop %1442 }
 0x16a   :  { %p1019_p1 = scmp.gt.f32.partialorder %s2200_s26, 0.0  ;;  %s2205_s27 = ssub.f32 %s2186_s23, %s2200_s26  ;;  %vm994_vm0 = vcmp.eq.f32.partialorder %v993_v48, 8.507059e+37  ;;  %v996_v21 = vor.u32 1.1754944e-38, %v995_v26  ;;  %v848_v48 = vsel %vm842_vm10, %v2236_v32, 0.0 }
 0x16b   :  { %s2232_s30 = spop %1444 }
 0x16c   :  { %s1020_s28 = scalar_select %p1019_p1, %s2200_s26, 1.0 }
 0x16d   :  { %p1041_p2 = scmp.gt.f32.partialorder %s2205_s27, 0.0  ;;  %s2238_s3 = spop %1446 }
 0x16e   :  { %v1552_v42 = vpop.eup %1551  ;;  %v2211_v57 = vstv %s1020_s28  ;;  %s1039_s13 = ssub.f32 %s2198_s25, %s2232_s30 }
 0x16f   :  { %v985_v44 = vmul.f32 %v1552_v42, %v983_v55  ;;  %1553 = vrcp.f32 %v2211_v57  ;;  %s1042_s29 = scalar_select %p1041_p2, %s2205_s27, 1.0  ;;  %vm990_vm13 = vweird.f32 %v1552_v42  ;;  %v1031_v7 = vand.u32 2147483647, %v2211_v57 }
 0x170   :  { %vm991_vm15 = vmor %vm989_vm14, %vm990_vm13  ;;  %v1033_v14 = vand.u32 2147483648, %v2211_v57  ;;  %vm1027_vm1 = vweird.f32 %v2211_v57  ;;  %v419_v55 = vrot.slane %v418_v25, 1  ;;  %vm860_vm14 = vcmp.eq.s32.totalorder %v2254_v53, 10 }
 0x171   :  { %v986_v23 = vsub.f32 1.0, %v985_v44  ;;  %v2226_v40 = vstv %s1042_s29  ;;  %vm2248_vm3 = vcmp.eq.f32.partialorder %v1031_v7, 8.507059e+37  ;;  %v414_v44 = vadd.f32 %v413_v18, %v412_v0 }
 0x172   :  { %1555 = vrcp.f32 %v2226_v40  ;;  %v1053_v38 = vand.u32 2147483647, %v2226_v40  ;;  %s2243_s4 = spop %1448  ;;  %v1055_v10 = vand.u32 2147483648, %v2226_v40  ;;  %v1034_v43 = vor.u32 1.1754944e-38, %v1033_v14 }
 0x173   :  { %v987_v9 = vmul.f32 %v1552_v42, %v986_v23  ;;  %p1061_p3 = scmp.gt.f32.partialorder %s2243_s4, 0.0  ;;  %s1081_s5 = smul.f32 2.0, %s2243_s4  ;;  %vm1049_vm4 = vweird.f32 %v2226_v40  ;;  %v420_v23 = vadd.f32 %v419_v55, %v418_v25  ;;  %v631_v14 = vmul.f32 0.0, %v414_v44 }
 0x174   :  { %vm2260_vm5 = vcmp.eq.f32.partialorder %v1053_v38, 8.507059e+37  ;;  %v1056_v58 = vor.u32 1.1754944e-38, %v1055_v10  ;;  %v830_v31 = vsel %vm824_vm2, %v414_v44, 0.0  ;;  %s1451_s7 = spop %1450 }
 0x175   :  { %v988_v20 = vadd.f32 %v1552_v42, %v987_v9  ;;  %v1554_v35 = vpop.eup %1553  ;;  %s1062_s6 = scalar_select %p1061_p3, %s2243_s4, 1.0  ;;  %v604_v34 = vmul.f32 0.0, %v420_v23  ;;  %v856_v56 = vadd.f32 %v848_v48, %v830_v31  ;;  %v866_v62 = vsel %vm860_vm14, %v631_v14, 0.0 }
 0x176   :  { %v1023_v59 = vmul.f32 %v1554_v35, %v2211_v57  ;;  %p2264_p4 = scmp.gt.f32.partialorder %s1081_s5, 0.0  ;;  %vm1028_vm6 = vweird.f32 %v1554_v35  ;;  %v847_v57 = vsel %vm842_vm10, %v2218_v2, 0.0  ;;  %v867_v47 = vsel %vm860_vm14, %v420_v23, 0.0 }
 0x177   :  { %v992_v8 = vsel %vm991_vm15, %v1552_v42, %v988_v20  ;;  %v2268_v33 = vstv %s1062_s6  ;;  %vm1029_vm11 = vmor %vm1027_vm1, %vm1028_vm6  ;;  %v831_v32 = vsel %vm824_vm2, %v604_v34, 0.0  ;;  %v855_v6 = vadd.f32 %v847_v57, %v829_v50 }
 0x178   :  { %v997_v51 = vsel %vm994_vm0, %v996_v21, %v992_v8  ;;  %v1556_v61 = vpop.eup %1555  ;;  %v1024_v45 = vsub.f32 1.0, %v1023_v59  ;;  %1557 = vrcp.f32 %v2268_v33  ;;  %s2436_s5 = smov (!%p2264_p4, %s1081_s5), 1.0  ;;  %v1073_v39 = vand.u32 2147483647, %v2268_v33 }
 0x179   :  { %1452 = vpush %v997_v51  ;;  %v1045_v17 = vmul.f32 %v1556_v61, %v2226_v40  ;;  %vm1050_vm9 = vweird.f32 %v1556_v61  ;;  %v1075_v19 = vand.u32 2147483648, %v2268_v33  ;;  %v2278_v3 = vstv %s2436_s5 }
 0x17a   :  { %v1025_v49 = vmul.f32 %v1554_v35, %v1024_v45  ;;  %1559 = vrcp.f32 %v2278_v3  ;;  %vm1051_vm12 = vmor %vm1049_vm4, %vm1050_vm9  ;;  %vm1069_vm7 = vweird.f32 %v2268_v33  ;;  %v1094_v27 = vand.u32 2147483647, %v2278_v3 }
 0x17b   :  { %v1046_v52 = vsub.f32 1.0, %v1045_v17  ;;  %v1076_v9 = vor.u32 1.1754944e-38, %v1075_v19  ;;  %v1096_v20 = vand.u32 2147483648, %v2278_v3  ;;  %v630_v21 = vmul.f32 0.0, %v408_v1 }
 0x17c   :  { %v1026_v22 = vadd.f32 %v1554_v35, %v1025_v49  ;;  %vm2299_vm8 = vcmp.eq.f32.partialorder %v1073_v39, 8.507059e+37  ;;  %v426_v8 = vadd.f32 %v425_v15, %v424_v36  ;;  %v849_v51 = vsel %vm842_vm10, %v1958_v11, 0.0 }
 0x17d   :  { %v1047_v37 = vmul.f32 %v1556_v61, %v1046_v52  ;;  %v857_v10 = vadd.f32 %v849_v51, %v831_v32  ;;  %v865_v11 = vsel %vm860_vm14, %v630_v21, 0.0  ;;  %v874_v63 = vadd.f32 %v866_v62, %v856_v56 }
 0x17e   :  { %v1030_v41 = vsel %vm1029_vm11, %v1554_v35, %v1026_v22  ;;  %v1558_v30 = vpop.eup %1557  ;;  %v605_v38 = vmul.f32 0.0, %v426_v8  ;;  %v868_v54 = vsel %vm860_vm14, %v426_v8, 0.0  ;;  %v873_v45 = vadd.f32 %v865_v11, %v855_v6 }
 0x17f   :  { %v1035_v16 = vsel %vm2248_vm3, %v1034_v43, %v1030_v41  ;;  %v1048_v42 = vadd.f32 %v1556_v61, %v1047_v37  ;;  %v1065_v2 = vmul.f32 %v1558_v30, %v2268_v33  ;;  %vm1070_vm13 = vweird.f32 %v1558_v30 }
 0x180   :  { %1454 = vpush %v1035_v16  ;;  %v1560_v24 = vpop.eup %1559  ;;  %v832_v12 = vsel %vm824_vm2, %v605_v38, 0.0  ;;  %v875_v17 = vadd.f32 %v867_v47, %v857_v10  ;;  %vm1071_vm15 = vmor %vm1069_vm7, %vm1070_vm13  ;;  %vm882_vm1 = vcmask 1042432   ;;  %vm1090_vm3 = vweird.f32 %v2278_v3 }
 0x181   :  { %v1052_v26 = vsel %vm1051_vm12, %v1556_v61, %v1048_v42  ;;  %v1066_v35 = vsub.f32 1.0, %v1065_v2  ;;  %v1086_v59 = vmul.f32 %v1560_v24, %v2278_v3  ;;  %v858_v43 = vadd.f32 %v850_v28, %v832_v12 }
 0x182   :  { %v1057_v40 = vsel %vm2260_vm5, %v1056_v58, %v1052_v26  ;;  %vm1091_vm0 = vweird.f32 %v1560_v24  ;;  %v883_v29 = vsel %vm882_vm1, %v873_v45, 0.0  ;;  %v884_v49 = vsel %vm882_vm1, %v874_v63, 0.0 }
 0x183   :  { %1456 = vpush %v1057_v40  ;;  %v1067_v4 = vmul.f32 %v1558_v30, %v1066_v35  ;;  %v1087_v13 = vsub.f32 1.0, %v1086_v59  ;;  %v876_v5 = vadd.f32 %v868_v54, %v858_v43  ;;  %v886_v58 = vsel %vm882_vm1, %v875_v17, 0.0  ;;  %vm1092_vm4 = vmor %vm1090_vm3, %vm1091_vm0 }
 0x184   :  { %v885_v46 = vadd.f32 %v884_v49, %v883_v29  ;;  %v1097_v33 = vor.u32 1.1754944e-38, %v1096_v20  ;;  %vm1095_vm5 = vcmp.eq.f32.partialorder %v1094_v27, 8.507059e+37  ;;  %vm1105_vm6 = vcmask 2048  }
 0x185   :  { %v1068_v61 = vadd.f32 %v1558_v30, %v1067_v4  ;;  %v1088_v60 = vmul.f32 %v1560_v24, %v1087_v13  ;;  %v888_v18 = vsel %vm882_vm1, %v876_v5, 0.0 }
 0x186   :  { %v887_v37 = vadd.f32 %v886_v58, %v885_v46 }
 0x187   :  { %v1072_v0 = vsel %vm1071_vm15, %v1558_v30, %v1068_v61  ;;  %v1089_v52 = vadd.f32 %v1560_v24, %v1088_v60 }
 0x188   :  { %v1077_v25 = vsel %vm2299_vm8, %v1076_v9, %v1072_v0  ;;  %v889_v19 = vadd.f32 %v888_v18, %v887_v37 }
 0x189   :  { %1458 = vpush %v1077_v25  ;;  %v1093_v22 = vsel %vm1092_vm4, %v1560_v24, %v1089_v52 }
 0x18a   :  { %v1098_v39 = vsel %vm1095_vm5, %v1097_v33, %v1093_v22  ;;  %890 = vadd.xlane.f32.xlu2 %v889_v19 }
 0x18b   :  { %1460 = vpush %v1098_v39 }
 0x1aa   :  { %s1453_s8 = spop %1452 }
 0x1ab   :  { %s999_s9 = smul.f32 %s1453_s8, %s2184_s1 }
 0x1ac   :  { %s1017_s10 = smul.f32 %s1453_s8, %s2198_s25 }
 0x1ad   :  { %s2438_s9 = smov (!%p981_p0, %s999_s9), 0.0 }
 0x1ae   :  { %s2440_s10 = smov (!%p981_p0, %s1017_s10), 0.0  ;;  %1392 = sst [smem:[#allocation2]] %s2438_s9 }
 0x1af   :  { %1394 = sst [smem:[#allocation2 + $0x1]] %s2440_s10 }
 0x1b1   :  { %s1455_s11 = spop %1454 }
 0x1b2   :  { %s1037_s12 = smul.f32 %s1455_s11, %s2232_s30 }
 0x1b4   :  { %s2442_s12 = smov (!%p1019_p1, %s1037_s12), 0.0  ;;  %s1457_s14 = spop %1456 }
 0x1b5   :  { %1396 = sst [smem:[#allocation2 + $0x2]] %s2442_s12  ;;  %s1059_s15 = smul.f32 %s1457_s14, %s1039_s13 }
 0x1b7   :  { %s2444_s15 = smov (!%p1041_p2, %s1059_s15), 0.0 }
 0x1b8   :  { %1398 = sst [smem:[#allocation2 + $0x3]] %s2444_s15 }
 0x1ba   :  { %s1459_s16 = spop %1458 }
 0x1bb   :  { %s1079_s17 = smul.f32 %s1459_s16, %s2238_s3 }
 0x1bc   :  { %s1461_s18 = spop %1460 }
 0x1bd   :  { %s2446_s17 = smov (!%p1061_p3, %s1079_s17), 0.0  ;;  %s1100_s19 = smul.f32 %s1461_s18, %s1451_s7 }
 0x1be   :  { %1406 = sst [smem:[#allocation2 + $0x7]] %s2446_s17 }
 0x1bf   :  { %s2448_s19 = smov (!%p2264_p4, %s1100_s19), 0.0 }
 0x1c0   :  { %1408 = sst [smem:[#allocation2 + $0x8]] %s2448_s19 }
 0x1c3   :  { %v1123_v36 = vpop.xlane.xlu2 %1122  ;;  %v1109_v3 = vpop.xlane.xlu1 %1108 }
 0x1c4   :  { %v1124_v41 = vrot.slane %v1123_v36, 4  ;;  %v1110_v1 = vrot.slane %v1109_v3, 4  ;;  %v1157_v30 = vpop.xlane.xlu0 %1156 }
 0x1c5   :  { %v1158_v7 = vrot.slane %v1157_v30, 4 }
 0x1c6   :  { %v1125_v55 = vadd.f32 %v1124_v41, %v1123_v36  ;;  %v1111_v16 = vadd.f32 %v1110_v1, %v1109_v3 }
 0x1c7   :  { %v1159_v28 = vadd.f32 %v1158_v7, %v1157_v30 }
 0x1c8   :  { %v1126_v42 = vrot.slane %v1125_v55, 2  ;;  %v1112_v44 = vrot.slane %v1111_v16, 2 }
 0x1c9   :  { %v1160_v38 = vrot.slane %v1159_v28, 2 }
 0x1ca   :  { %v1113_v23 = vadd.f32 %v1112_v44, %v1111_v16  ;;  %v1127_v57 = vadd.f32 %v1126_v42, %v1125_v55 }
 0x1cb   :  { %v1203_v15 = vpop.xlane.xlu2 %1202  ;;  %v1189_v40 = vpop.xlane.xlu1 %1188  ;;  %v1161_v10 = vadd.f32 %v1160_v38, %v1159_v28 }
 0x1cc   :  { %v1114_v48 = vrot.slane %v1113_v23, 1  ;;  %v1128_v26 = vrot.slane %v1127_v57, 1  ;;  %v1190_v31 = vrot.slane %v1189_v40, 4  ;;  %v1204_v32 = vrot.slane %v1203_v15, 4  ;;  %v1237_v49 = vpop.xlane.xlu0 %1236 }
 0x1cd   :  { %v1162_v47 = vrot.slane %v1161_v10, 1  ;;  %v1238_v25 = vrot.slane %v1237_v49, 4 }
 0x1ce   :  { %v1115_v9 = vadd.f32 %v1114_v48, %v1113_v23  ;;  %v1129_v27 = vadd.f32 %v1128_v26, %v1127_v57  ;;  %v1191_v24 = vadd.f32 %v1190_v31, %v1189_v40  ;;  %v1205_v35 = vadd.f32 %v1204_v32, %v1203_v15 }
 0x1cf   :  { %v1163_v5 = vadd.f32 %v1162_v47, %v1161_v10  ;;  %v1239_v33 = vadd.f32 %v1238_v25, %v1237_v49 }
 0x1d0   :  { %1462 = vpush %v1115_v9  ;;  %v1192_v6 = vrot.slane %v1191_v24, 2  ;;  %v1206_v56 = vrot.slane %v1205_v35, 2 }
 0x1d1   :  { %1464 = vpush %v1129_v27  ;;  %v1240_v22 = vrot.slane %v1239_v33, 2 }
 0x1d2   :  { %v1193_v12 = vadd.f32 %v1192_v6, %v1191_v24  ;;  %v1207_v62 = vadd.f32 %v1206_v56, %v1205_v35 }
 0x1d3   :  { %v1251_v58 = vpop.xlane.xlu1 %1250  ;;  %v1241_v36 = vadd.f32 %v1240_v22, %v1239_v33 }
 0x1d4   :  { %v1194_v61 = vrot.slane %v1193_v12, 1  ;;  %v1208_v63 = vrot.slane %v1207_v62, 1  ;;  %v1252_v52 = vrot.slane %v1251_v58, 4  ;;  %v1285_v15 = vpop.xlane.xlu0 %1284 }
 0x1d5   :  { %v1242_v42 = vrot.slane %v1241_v36, 1  ;;  %v1286_v40 = vrot.slane %v1285_v15, 4 }
 0x1d6   :  { %v1195_v0 = vadd.f32 %v1194_v61, %v1193_v12  ;;  %v1209_v29 = vadd.f32 %v1208_v63, %v1207_v62  ;;  %v1253_v18 = vadd.f32 %v1252_v52, %v1251_v58 }
 0x1d7   :  { %v1243_v9 = vadd.f32 %v1242_v42, %v1241_v36  ;;  %v1590_v36 = vmov 2.0  }
 0x1d8   :  { %v1254_v37 = vrot.slane %v1253_v18, 2 }
 0x1da   :  { %v1255_v41 = vadd.f32 %v1254_v37, %v1253_v18 }
 0x1dc   :  { %v1256_v23 = vrot.slane %v1255_v41, 1 }
 0x1de   :  { %v1257_v27 = vadd.f32 %v1256_v23, %v1255_v41 }
 0x1fd   :  { %v891_v20 = vpop.xlane.xlu2 %890 }
 0x1fe   :  { %v1329_v34 = vsel %vm842_vm10, %v891_v20, 0.0  ;;  %v1294_v21 = vsel %vm824_vm2, %v891_v20, 0.0  ;;  %v1343_v2 = vsel %vm860_vm14, %v891_v20, 0.0 }
 0x1ff   :  { %v1331_v8 = vsel %vm1105_vm6, %v1329_v34, 0.0  ;;  %v1296_v14 = vsel %vm1105_vm6, %v1294_v21, 0.0  ;;  %v1345_v50 = vsel %vm1105_vm6, %v1343_v2, 0.0  ;;  %v1287_v21 = vadd.f32 %v1286_v40, %v1285_v15 }
 0x200   :  { %1333 = vadd.xlane.f32.xlu2 %v1331_v8  ;;  %1298 = vadd.xlane.f32.xlu1 %v1296_v14 }
 0x201   :  { %s2360_s20 = spop %1462  ;;  %1347 = vadd.xlane.f32.xlu0 %v1345_v50  ;;  %v1288_v7 = vrot.slane %v1287_v21, 2 }
 0x202   :  { %p1131_p5 = scmp.gt.f32.partialorder %s2360_s20, 0.0  ;;  %s1465_s22 = spop %1464 }
 0x203   :  { %v1289_v31 = vadd.f32 %v1288_v7, %v1287_v21 }
 0x204   :  { %s1132_s21 = scalar_select %p1131_p5, %s2360_s20, 1.0 }
 0x205   :  { %v1290_v38 = vrot.slane %v1289_v31, 1 }
 0x206   :  { %v1133_v51 = vstv %s1132_s21 }
 0x207   :  { %1561 = vrcp.f32 %v1133_v51  ;;  %v1145_v11 = vand.u32 2147483648, %v1133_v51  ;;  %v1143_v43 = vand.u32 2147483647, %v1133_v51  ;;  %vm1139_vm10 = vweird.f32 %v1133_v51 }
 0x209   :  { %v1146_v45 = vor.u32 1.1754944e-38, %v1145_v11  ;;  %vm1144_vm12 = vcmp.eq.f32.partialorder %v1143_v43, 8.507059e+37 }
 0x20d   :  { %v1562_v53 = vpop.eup %1561 }
 0x20e   :  { %v1135_v59 = vmul.f32 %v1562_v53, %v1133_v51  ;;  %vm1140_vm9 = vweird.f32 %v1562_v53 }
 0x20f   :  { %vm1141_vm11 = vmor %vm1139_vm10, %vm1140_vm9 }
 0x210   :  { %v1136_v4 = vsub.f32 1.0, %v1135_v59 }
 0x212   :  { %v1137_v13 = vmul.f32 %v1562_v53, %v1136_v4  ;;  %v1291_v4 = vadd.f32 %v1290_v38, %v1289_v31 }
 0x214   :  { %v1138_v54 = vadd.f32 %v1562_v53, %v1137_v13 }
 0x216   :  { %v1142_v17 = vsel %vm1141_vm11, %v1562_v53, %v1138_v54 }
 0x217   :  { %v1147_v60 = vsel %vm1144_vm12, %v1146_v45, %v1142_v17 }
 0x218   :  { %1466 = vpush %v1147_v60 }
 0x219   :  { %1468 = vpush %v1163_v5 }
 0x21a   :  { %1470 = vpush %v1195_v0 }
 0x21b   :  { %1472 = vpush %v1209_v29 }
 0x249   :  { %s1467_s1 = spop %1466 }
 0x24a   :  { %s1149_s23 = smul.f32 %s1467_s1, %s1465_s22  ;;  %s1469_s24 = spop %1468 }
 0x24b   :  { %s1181_s25 = smul.f32 %s1469_s24, %s1467_s1  ;;  %s2372_s26 = spop %1470 }
 0x24c   :  { %s2450_s23 = smov (!%p1131_p5, %s1149_s23), 0.0  ;;  %s2381_s27 = spop %1472 }
 0x24d   :  { %s2452_s25 = smov (!%p1131_p5, %s1181_s25), 0.0  ;;  %1400 = sst [smem:[#allocation2 + $0x4]] %s2450_s23 }
 0x24e   :  { %1402 = sst [smem:[#allocation2 + $0x5]] %s2452_s25  ;;  %p1211_p6 = scmp.gt.f32.partialorder %s2381_s27, 0.0 }
 0x250   :  { %s1212_s28 = scalar_select %p1211_p6, %s2381_s27, 1.0 }
 0x251   :  { %s1386_s27 = sadd.f32 %s2450_s23, %s2438_s9 }
 0x252   :  { %v1213_v46 = vstv %s1212_s28 }
 0x253   :  { %1563 = vrcp.f32 %v1213_v46  ;;  %v1225_v1 = vand.u32 2147483648, %v1213_v46  ;;  %v1223_v16 = vand.u32 2147483647, %v1213_v46  ;;  %vm1219_vm7 = vweird.f32 %v1213_v46 }
 0x255   :  { %v1226_v57 = vor.u32 1.1754944e-38, %v1225_v1  ;;  %vm1224_vm13 = vcmp.eq.f32.partialorder %v1223_v16, 8.507059e+37 }
 0x259   :  { %v1564_v39 = vpop.eup %1563 }
 0x25a   :  { %v1215_v19 = vmul.f32 %v1564_v39, %v1213_v46  ;;  %vm1220_vm2 = vweird.f32 %v1564_v39 }
 0x25b   :  { %vm1221_vm8 = vmor %vm1219_vm7, %vm1220_vm2 }
 0x25c   :  { %v1216_v3 = vsub.f32 1.0, %v1215_v19 }
 0x25e   :  { %v1217_v55 = vmul.f32 %v1564_v39, %v1216_v3 }
 0x260   :  { %v1218_v44 = vadd.f32 %v1564_v39, %v1217_v55 }
 0x262   :  { %v1222_v48 = vsel %vm1221_vm8, %v1564_v39, %v1218_v44 }
 0x263   :  { %v1227_v26 = vsel %vm1224_vm13, %v1226_v57, %v1222_v48 }
 0x264   :  { %1474 = vpush %v1227_v26 }
 0x265   :  { %1476 = vpush %v1243_v9 }
 0x266   :  { %1478 = vpush %v1257_v27 }
 0x273   :  { %v1299_v30 = vpop.xlane.xlu1 %1298  ;;  %v1334_v11 = vpop.xlane.xlu2 %1333 }
 0x274   :  { %v1300_v20 = vrot.slane %v1299_v30, 4  ;;  %v1348_v62 = vpop.xlane.xlu0 %1347  ;;  %v1335_v13 = vrot.slane %v1334_v11, 4 }
 0x275   :  { %v1349_v43 = vrot.slane %v1348_v62, 4 }
 0x276   :  { %v1301_v2 = vadd.f32 %v1300_v20, %v1299_v30  ;;  %v1336_v54 = vadd.f32 %v1335_v13, %v1334_v11 }
 0x277   :  { %v1350_v61 = vadd.f32 %v1349_v43, %v1348_v62 }
 0x278   :  { %v1302_v8 = vrot.slane %v1301_v2, 2  ;;  %v1337_v45 = vrot.slane %v1336_v54, 2 }
 0x279   :  { %v1351_v63 = vrot.slane %v1350_v61, 2 }
 0x27a   :  { %v1303_v51 = vadd.f32 %v1302_v8, %v1301_v2  ;;  %v1338_v5 = vadd.f32 %v1337_v45, %v1336_v54 }
 0x27b   :  { %v1352_v0 = vadd.f32 %v1351_v63, %v1350_v61 }
 0x27c   :  { %v1304_v53 = vrot.slane %v1303_v51, 1  ;;  %v1339_v52 = vrot.slane %v1338_v5, 1 }
 0x27d   :  { %v1353_v33 = vrot.slane %v1352_v0, 1 }
 0x27e   :  { %v1305_v12 = vadd.f32 %v1304_v53, %v1303_v51  ;;  %v1340_v39 = vadd.f32 %v1339_v52, %v1338_v5 }
 0x27f   :  { %v1354_v19 = vadd.f32 %v1353_v33, %v1352_v0 }
 0x295   :  { %s1475_s29 = spop %1474 }
 0x296   :  { %s1229_s30 = smul.f32 %s1475_s29, %s2372_s26  ;;  %s2388_s3 = spop %1476 }
 0x297   :  { %s2390_s4 = spop %1478 }
 0x298   :  { %s2454_s30 = smov (!%p1211_p6, %s1229_s30), 0.0  ;;  %p1259_p7 = scmp.gt.f32.partialorder %s2390_s4, 0.0 }
 0x299   :  { %1410 = sst [smem:[#allocation2 + $0x9]] %s2454_s30 }
 0x29a   :  { %s1260_s5 = scalar_select %p1259_p7, %s2390_s4, 1.0 }
 0x29c   :  { %v1261_v34 = vstv %s1260_s5  ;;  %s1420_s5 = sshll.u32 %s2423_s2, 4  ;;  %s1421_s5 = int_to_ptr.hbm [resolvable:$true] %s1420_s5 }
 0x29d   :  { %1565 = vrcp.f32 %v1261_v34  ;;  %v1273_v28 = vand.u32 2147483648, %v1261_v34  ;;  %v1271_v35 = vand.u32 2147483647, %v1261_v34  ;;  %vm1267_vm15 = vweird.f32 %v1261_v34 }
 0x29f   :  { %v1274_v56 = vor.u32 1.1754944e-38, %v1273_v28  ;;  %vm1272_vm1 = vcmp.eq.f32.partialorder %v1271_v35, 8.507059e+37 }
 0x2a3   :  { %v1566_v14 = vpop.eup %1565 }
 0x2a4   :  { %v1263_v50 = vmul.f32 %v1566_v14, %v1261_v34  ;;  %vm1268_vm14 = vweird.f32 %v1566_v14 }
 0x2a5   :  { %vm1269_vm0 = vmor %vm1267_vm15, %vm1268_vm14 }
 0x2a6   :  { %v1264_v32 = vsub.f32 1.0, %v1263_v50 }
 0x2a8   :  { %v1265_v24 = vmul.f32 %v1566_v14, %v1264_v32 }
 0x2aa   :  { %v1266_v6 = vadd.f32 %v1566_v14, %v1265_v24 }
 0x2ac   :  { %v1270_v59 = vsel %vm1269_vm0, %v1566_v14, %v1266_v6 }
 0x2ad   :  { %v1275_v10 = vsel %vm1272_vm1, %v1274_v56, %v1270_v59 }
 0x2ae   :  { %1480 = vpush %v1275_v10 }
 0x2af   :  { %1482 = vpush %v1291_v4 }
 0x2b0   :  { %1484 = vpush %v1305_v12 }
 0x2df   :  { %s1481_s6 = spop %1480 }
 0x2e0   :  { %s1277_s0 = smul.f32 %s1481_s6, %s2388_s3  ;;  %s2402_s7 = spop %1482 }
 0x2e1   :  { %s1485_s8 = spop %1484  ;;  %s1307_s11 = sadd.f32 1.0, %s2402_s7 }
 0x2e2   :  { %s2456_s0 = smov (!%p1259_p7, %s1277_s0), 0.0  ;;  %s1308_s10 = sadd.f32 1.0, %s1485_s8 }
 0x2e3   :  { %1412 = sst [smem:[#allocation2 + $0xa]] %s2456_s0  ;;  %s1591_s7 = smov [#allocation2]  }
 0x2e4   :  { %v1309_v47 = vstv %s1308_s10 }
 0x2e5   :  { %1567 = vrcp.f32 %v1309_v47  ;;  %v1321_v49 = vand.u32 2147483648, %v1309_v47  ;;  %v1319_v25 = vand.u32 2147483647, %v1309_v47  ;;  %vm1315_vm4 = vweird.f32 %v1309_v47 }
 0x2e6   :  { %1569 = vrcp.f32 %v1590_v36 }
 0x2e7   :  { %v1322_v18 = vor.u32 1.1754944e-38, %v1321_v49  ;;  %vm1320_vm6 = vcmp.eq.f32.partialorder %v1319_v25, 8.507059e+37 }
 0x2eb   :  { %v1568_v17 = vpop.eup %1567 }
 0x2ec   :  { %v1311_v60 = vmul.f32 %v1568_v17, %v1309_v47  ;;  %vm1316_vm3 = vweird.f32 %v1568_v17  ;;  %v1570_v3 = vpop.eup %1569 }
 0x2ed   :  { %vm1317_vm5 = vmor %vm1315_vm4, %vm1316_vm3  ;;  %v1378_v1 = vmul.f32 2.0, %v1570_v3  ;;  %vm1382_vm10 = vweird.f32 %v1570_v3 }
 0x2ee   :  { %v1312_v29 = vsub.f32 1.0, %v1311_v60 }
 0x2ef   :  { %v1379_v55 = vsub.f32 1.0, %v1378_v1 }
 0x2f0   :  { %v1313_v58 = vmul.f32 %v1568_v17, %v1312_v29 }
 0x2f1   :  { %v1380_v44 = vmul.f32 %v1570_v3, %v1379_v55 }
 0x2f2   :  { %v1314_v46 = vadd.f32 %v1568_v17, %v1313_v58 }
 0x2f3   :  { %v1381_v9 = vadd.f32 %v1570_v3, %v1380_v44 }
 0x2f4   :  { %v1318_v22 = vsel %vm1317_vm5, %v1568_v17, %v1314_v46 }
 0x2f5   :  { %v1323_v37 = vsel %vm1320_vm6, %v1322_v18, %v1318_v22  ;;  %v1383_v40 = vsel %vm1382_vm10, %v1570_v3, %v1381_v9 }
 0x2f6   :  { %1486 = vpush %v1323_v37 }
 0x2f7   :  { %1488 = vpush %v1340_v39 }
 0x2f8   :  { %1490 = vpush %v1354_v19 }
 0x327   :  { %s1487_s12 = spop %1486 }
 0x328   :  { %s2407_s13 = smul.f32 %s1487_s12, %s1307_s11  ;;  %s2409_s14 = spop %1488 }
 0x329   :  { %s1491_s15 = spop %1490  ;;  %s1356_s18 = sadd.f32 1.0, %s2409_s14 }
 0x32a   :  { %s1357_s16 = sadd.f32 1.0, %s1491_s15 }
 0x32b   :  { %s1326_s22 = ssub.f32 1.0, %s2407_s13 }
 0x32c   :  { %v1358_v41 = vstv %s1357_s16 }
 0x32d   :  { %1571 = vrcp.f32 %v1358_v41  ;;  %v1370_v57 = vand.u32 2147483648, %v1358_v41  ;;  %v1368_v26 = vand.u32 2147483647, %v1358_v41  ;;  %vm1364_vm11 = vweird.f32 %v1358_v41 }
 0x32f   :  { %v1371_v15 = vor.u32 1.1754944e-38, %v1370_v57  ;;  %vm1369_vm2 = vcmp.eq.f32.partialorder %v1368_v26, 8.507059e+37 }
 0x333   :  { %v1572_v16 = vpop.eup %1571 }
 0x334   :  { %v1360_v42 = vmul.f32 %v1572_v16, %v1358_v41  ;;  %vm1365_vm9 = vweird.f32 %v1572_v16 }
 0x335   :  { %vm1366_vm12 = vmor %vm1364_vm11, %vm1365_vm9 }
 0x336   :  { %v1361_v23 = vsub.f32 1.0, %v1360_v42 }
 0x338   :  { %v1362_v48 = vmul.f32 %v1572_v16, %v1361_v23 }
 0x33a   :  { %v1363_v27 = vadd.f32 %v1572_v16, %v1362_v48 }
 0x33c   :  { %v1367_v30 = vsel %vm1366_vm12, %v1572_v16, %v1363_v27 }
 0x33d   :  { %v1372_v20 = vsel %vm1369_vm2, %v1371_v15, %v1367_v30 }
 0x33e   :  { %1492 = vpush %v1372_v20 }
 0x33f   :  { %1494 = vpush %v1383_v40 }
 0x36f   :  { %s1493_s20 = spop %1492 }
 0x370   :  { %s1374_s21 = smul.f32 %s1493_s20, %s1356_s18  ;;  %s1495_s24 = spop %1494 }
 0x372   :  { %s1375_s1 = ssub.f32 1.0, %s1374_s21 }
 0x374   :  { %s1376_s25 = sadd.f32 %s1375_s1, %s1326_s22 }
 0x376   :  { %s1385_s26 = smul.f32 %s1495_s24, %s1376_s25 }
 0x378   :  { %s1387_s28 = sadd.f32 %s1386_s27, %s1385_s26 }
 0x379   :  { %1404 = sst [smem:[#allocation2 + $0x6]] %s1385_s26 }
 0x37a   :  { %s1388_s29 = sadd.f32 %s1387_s28, %s2446_s17 }
 0x37c   :  { %s1389_s6 = sadd.f32 %s1388_s29, %s2448_s19 }
 0x37e   :  { %s1390_s0 = sadd.f32 %s1389_s6, %s2454_s30 }
 0x380   :  { %1414 = sst [smem:[#allocation2 + $0xb]] %s1390_s0 }
 0x381   :  { %1423 = dma.smem_to_hbm %s1591_s7, 16, %s1421_s5, [#allocation3]  }
 0x382   :  { %1585 = dma.done.wait [#allocation3], 16  }
 0x383   :  { %1586 = vsyncadd [#allocation3], 4294967280 }
 0x384   :  { %1428 = sfence }
 0x385   :  { %1429 = vsyncpa [#allocation3], 1 }

</bundles_post_ra>
